<compile_context>
chip_gen: v7x
topology: tpu7x:2x2x1
jax: 0.10.0
libtpu: 0.0.40
codegen_flags: <defaults>
</compile_context>

<pallas_src>
import functools

import jax
import jax.numpy as jnp
from jax import lax
from jax.experimental import pallas as pl
from jax.experimental.pallas import tpu as pltpu

IN_DIM = 20
HID = 50
OUT_DIM = 10

HID_PAD = 64     # 50 -> 64: multiple-of-8 sublane dim for weight tiles
OUT_PAD = 128    # 10 -> 128: lane-dense output stores (no vst.msk)


def _round_up(n, m):
    return (n + m - 1) // m * m


def _pod_map_kernel(x_ref,
                    w_inp_ref, b_inp_ref,
                    w1_ref, b1_ref,
                    w2_ref, b2_ref,
                    w3_ref, b3_ref,
                    w_out_ref, b_out_ref,
                    o_ref, *, sub_b, n_sub):
    """Processes one (TB, IN_DIM) batch tile in SUB-row sub-chunks."""

    def body(s, carry):
        r = pl.multiple_of(s * sub_b, sub_b)
        xb = x_ref[pl.ds(r, sub_b), :]

        # y = inp(x)
        y = jnp.dot(xb, w_inp_ref[...],
                    preferred_element_type=jnp.float32) + b_inp_ref[...]
        # y = tanh(l_k(y)) + y, k = 1..3
        y = jnp.tanh(jnp.dot(y, w1_ref[...],
                             preferred_element_type=jnp.float32)
                     + b1_ref[...]) + y
        y = jnp.tanh(jnp.dot(y, w2_ref[...],
                             preferred_element_type=jnp.float32)
                     + b2_ref[...]) + y
        y = jnp.tanh(jnp.dot(y, w3_ref[...],
                             preferred_element_type=jnp.float32)
                     + b3_ref[...]) + y
        # y = out(y)   (lane-dense, padded to OUT_PAD columns)
        o_ref[pl.ds(r, sub_b), :] = (
            jnp.dot(y, w_out_ref[...], preferred_element_type=jnp.float32)
            + b_out_ref[...])
        return carry

    lax.fori_loop(0, n_sub, body, 0, unroll=True)


def _pad_params(p):
    """Zero-pad weights/biases to HID_PAD / OUT_PAD shapes (numerically exact:
    padded hidden columns stay identically zero through the residual tanh
    layers; padded output columns are sliced off outside the kernel)."""
    def pad2(a, rows, cols):
        r, c = a.shape
        return jnp.pad(a, ((0, rows - r), (0, cols - c)))

    return {
        "w_inp": pad2(p["w_inp"], IN_DIM, HID_PAD),
        "b_inp": pad2(p["b_inp"], 1, HID_PAD),
        "w1": pad2(p["w1"], HID_PAD, HID_PAD),
        "b1": pad2(p["b1"], 1, HID_PAD),
        "w2": pad2(p["w2"], HID_PAD, HID_PAD),
        "b2": pad2(p["b2"], 1, HID_PAD),
        "w3": pad2(p["w3"], HID_PAD, HID_PAD),
        "b3": pad2(p["b3"], 1, HID_PAD),
        "w_out": pad2(p["w_out"], HID_PAD, OUT_PAD),
        "b_out": pad2(p["b_out"], 1, OUT_PAD),
    }


def local_pod_map(x, params, *, block_b=1024, sub_b=256):
    """x: (B, 20) float32. params: dict of (in, out) weights and (1, out) biases."""
    B = x.shape[0]

    # Outer tile per grid step (shrunk for tiny batches) + inner sub-chunking.
    tb = min(block_b, _round_up(max(B, 1), sub_b))
    tb = _round_up(tb, sub_b)
    n_sub = tb // sub_b
    bp = _round_up(B, tb)
    nb = bp // tb

    xp = x if bp == B else jnp.pad(x, ((0, bp - B), (0, 0)))
    pp = _pad_params(params)

    args = (
        xp,
        pp["w_inp"], pp["b_inp"],
        pp["w1"], pp["b1"],
        pp["w2"], pp["b2"],
        pp["w3"], pp["b3"],
        pp["w_out"], pp["b_out"],
    )

    # x tiles over the batch; weights/biases use constant index_maps so they
    # stay VMEM-resident across all grid steps (~60 KiB total, no re-DMA).
    in_specs = [pl.BlockSpec((tb, IN_DIM), lambda i: (i, 0))]
    in_specs += [pl.BlockSpec(a.shape, lambda i: (0, 0)) for a in args[1:]]

    flops = 2 * bp * (IN_DIM * HID_PAD + 3 * HID_PAD * HID_PAD
                      + HID_PAD * OUT_PAD)
    transcendentals = 3 * bp * HID_PAD
    bytes_accessed = 4 * (bp * (IN_DIM + OUT_PAD)
                          + IN_DIM * HID_PAD + 3 * HID_PAD * HID_PAD
                          + HID_PAD * OUT_PAD + 4 * HID_PAD + OUT_PAD)

    kernel = functools.partial(_pod_map_kernel, sub_b=sub_b, n_sub=n_sub)

    out_padded = pl.pallas_call(
        kernel,
        out_shape=jax.ShapeDtypeStruct((bp, OUT_PAD), jnp.float32),
        grid=(nb,),
        in_specs=in_specs,
        out_specs=pl.BlockSpec((tb, OUT_PAD), lambda i: (i, 0)),
        compiler_params=pltpu.CompilerParams(
            dimension_semantics=("parallel",)),
        cost_estimate=pl.CostEstimate(
            flops=flops,
            transcendentals=transcendentals,
            bytes_accessed=bytes_accessed),
    )(*args)

    return out_padded[:B, :OUT_DIM]


def init_params(key):
    """Deterministic init mimicking torch.nn.Linear default (uniform +-1/sqrt(fan_in)).
    Weights are stored transposed relative to PyTorch: (in, out)."""
    def linear(key, fan_in, fan_out):
        kw, kb = jax.random.split(key)
        bound = 1.0 / jnp.sqrt(float(fan_in))
        w = jax.random.uniform(kw, (fan_in, fan_out), jnp.float32, -bound, bound)
        b = jax.random.uniform(kb, (1, fan_out), jnp.float32, -bound, bound)
        return w, b

    keys = jax.random.split(key, 5)
    w_inp, b_inp = linear(keys[0], IN_DIM, HID)
    w1, b1 = linear(keys[1], HID, HID)
    w2, b2 = linear(keys[2], HID, HID)
    w3, b3 = linear(keys[3], HID, HID)
    w_out, b_out = linear(keys[4], HID, OUT_DIM)
    return {
        "w_inp": w_inp, "b_inp": b_inp,
        "w1": w1, "b1": b1,
        "w2": w2, "b2": b2,
        "w3": w3, "b3": b3,
        "w_out": w_out, "b_out": b_out,
    }


def reference_forward(x, p):
    y = x @ p["w_inp"] + p["b_inp"]
    y = jnp.tanh(y @ p["w1"] + p["b1"]) + y
    y = jnp.tanh(y @ p["w2"] + p["b2"]) + y
    y = jnp.tanh(y @ p["w3"] + p["b3"]) + y
    return y @ p["w_out"] + p["b_out"]


if __name__ == "__main__":
    key = jax.random.PRNGKey(0)
    k_params, k_x1, k_x2 = jax.random.split(key, 3)
    params = init_params(k_params)

    # Primary small-shape check.
    B = 8
    x = jax.random.normal(k_x1, (B, IN_DIM), jnp.float32)
    out = jax.block_until_ready(local_pod_map(x, params))
    ref = reference_forward(x, params)
    assert out.shape == (B, OUT_DIM), out.shape
    assert jnp.allclose(out, ref, atol=1e-4, rtol=1e-4), float(
        jnp.max(jnp.abs(out - ref)))

    # Exercise the batch-padding + multi-sub-chunk path (B not a multiple of sub_b).
    x2 = jax.random.normal(k_x2, (300, IN_DIM), jnp.float32)
    out2 = jax.block_until_ready(local_pod_map(x2, params))
    ref2 = reference_forward(x2, params)
    assert out2.shape == (300, OUT_DIM), out2.shape
    assert jnp.allclose(out2, ref2, atol=1e-4, rtol=1e-4), float(
        jnp.max(jnp.abs(out2 - ref2)))

    print("KERNEL_OK")
</pallas_src>

<mosaic_0001>
module attributes {stable_mosaic.version = 11 : i64} {
  func.func @_pod_map_kernel(%arg0: i32, %arg1: memref<256x20xf32, #tpu.memory_space<vmem>>, %arg2: memref<20x64xf32, #tpu.memory_space<vmem>>, %arg3: memref<1x64xf32, #tpu.memory_space<vmem>>, %arg4: memref<64x64xf32, #tpu.memory_space<vmem>>, %arg5: memref<1x64xf32, #tpu.memory_space<vmem>>, %arg6: memref<64x64xf32, #tpu.memory_space<vmem>>, %arg7: memref<1x64xf32, #tpu.memory_space<vmem>>, %arg8: memref<64x64xf32, #tpu.memory_space<vmem>>, %arg9: memref<1x64xf32, #tpu.memory_space<vmem>>, %arg10: memref<64x128xf32, #tpu.memory_space<vmem>>, %arg11: memref<1x128xf32, #tpu.memory_space<vmem>>, %arg12: memref<256x128xf32, #tpu.memory_space<vmem>>) attributes {dimension_semantics = [#tpu.dimension_semantics<parallel>], iteration_bounds = array<i64: 1>, scalar_prefetch = 0 : i64, scratch_operands = 0 : i64, tpu.core_type = #tpu.core_type<tc>, window_params = [{transform_indices = @transform_0, window_bounds = array<i64: 256, 20>}, {pipeline_mode = #tpu.pipeline_mode<synchronous>, transform_indices = @transform_1, window_bounds = array<i64: 20, 64>}, {pipeline_mode = #tpu.pipeline_mode<synchronous>, transform_indices = @transform_2, window_bounds = array<i64: 1, 64>}, {pipeline_mode = #tpu.pipeline_mode<synchronous>, transform_indices = @transform_3, window_bounds = array<i64: 64, 64>}, {pipeline_mode = #tpu.pipeline_mode<synchronous>, transform_indices = @transform_4, window_bounds = array<i64: 1, 64>}, {pipeline_mode = #tpu.pipeline_mode<synchronous>, transform_indices = @transform_5, window_bounds = array<i64: 64, 64>}, {pipeline_mode = #tpu.pipeline_mode<synchronous>, transform_indices = @transform_6, window_bounds = array<i64: 1, 64>}, {pipeline_mode = #tpu.pipeline_mode<synchronous>, transform_indices = @transform_7, window_bounds = array<i64: 64, 64>}, {pipeline_mode = #tpu.pipeline_mode<synchronous>, transform_indices = @transform_8, window_bounds = array<i64: 1, 64>}, {pipeline_mode = #tpu.pipeline_mode<synchronous>, transform_indices = @transform_9, window_bounds = array<i64: 64, 128>}, {pipeline_mode = #tpu.pipeline_mode<synchronous>, transform_indices = @transform_10, window_bounds = array<i64: 1, 128>}, {transform_indices = @transform_11, window_bounds = array<i64: 256, 128>}]} {
    %c0_i32 = arith.constant 0 : i32
    %c256_i32 = arith.constant 256 : i32
    %0 = arith.muli %c0_i32, %c256_i32 : i32
    %1 = tpu.assume_multiple %0, 256 : i32
    %2 = arith.index_cast %1 : i32 to index
    %c0 = arith.constant 0 : index
    %3 = vector.load %arg1[%2, %c0] : memref<256x20xf32, #tpu.memory_space<vmem>>, vector<256x20xf32>
    %c0_0 = arith.constant 0 : index
    %c0_1 = arith.constant 0 : index
    %4 = vector.load %arg2[%c0_0, %c0_1] : memref<20x64xf32, #tpu.memory_space<vmem>>, vector<20x64xf32>
    %cst = arith.constant dense<0.000000e+00> : vector<256x64xf32>
    %5 = tpu.matmul %3, %4, %cst {dimension_numbers = #tpu.dot_dimension_numbers<[1], [0], [0], [1], [0, 0, 1, 1], [], []>} : vector<256x20xf32>, vector<20x64xf32>, vector<256x64xf32> -> vector<256x64xf32>
    %c0_2 = arith.constant 0 : index
    %c0_3 = arith.constant 0 : index
    %6 = vector.load %arg3[%c0_2, %c0_3] : memref<1x64xf32, #tpu.memory_space<vmem>>, vector<1x64xf32>
    %7 = vector.broadcast %6 : vector<1x64xf32> to vector<256x64xf32>
    %8 = arith.addf %5, %7 : vector<256x64xf32>
    %c0_4 = arith.constant 0 : index
    %c0_5 = arith.constant 0 : index
    %9 = vector.load %arg4[%c0_4, %c0_5] : memref<64x64xf32, #tpu.memory_space<vmem>>, vector<64x64xf32>
    %cst_6 = arith.constant dense<0.000000e+00> : vector<256x64xf32>
    %10 = tpu.matmul %8, %9, %cst_6 {dimension_numbers = #tpu.dot_dimension_numbers<[1], [0], [0], [1], [0, 0, 1, 1], [], []>} : vector<256x64xf32>, vector<64x64xf32>, vector<256x64xf32> -> vector<256x64xf32>
    %c0_7 = arith.constant 0 : index
    %c0_8 = arith.constant 0 : index
    %11 = vector.load %arg5[%c0_7, %c0_8] : memref<1x64xf32, #tpu.memory_space<vmem>>, vector<1x64xf32>
    %12 = vector.broadcast %11 : vector<1x64xf32> to vector<256x64xf32>
    %13 = arith.addf %10, %12 : vector<256x64xf32>
    %14 = math.tanh %13 : vector<256x64xf32>
    %15 = arith.addf %14, %8 : vector<256x64xf32>
    %c0_9 = arith.constant 0 : index
    %c0_10 = arith.constant 0 : index
    %16 = vector.load %arg6[%c0_9, %c0_10] : memref<64x64xf32, #tpu.memory_space<vmem>>, vector<64x64xf32>
    %cst_11 = arith.constant dense<0.000000e+00> : vector<256x64xf32>
    %17 = tpu.matmul %15, %16, %cst_11 {dimension_numbers = #tpu.dot_dimension_numbers<[1], [0], [0], [1], [0, 0, 1, 1], [], []>} : vector<256x64xf32>, vector<64x64xf32>, vector<256x64xf32> -> vector<256x64xf32>
    %c0_12 = arith.constant 0 : index
    %c0_13 = arith.constant 0 : index
    %18 = vector.load %arg7[%c0_12, %c0_13] : memref<1x64xf32, #tpu.memory_space<vmem>>, vector<1x64xf32>
    %19 = vector.broadcast %18 : vector<1x64xf32> to vector<256x64xf32>
    %20 = arith.addf %17, %19 : vector<256x64xf32>
    %21 = math.tanh %20 : vector<256x64xf32>
    %22 = arith.addf %21, %15 : vector<256x64xf32>
    %c0_14 = arith.constant 0 : index
    %c0_15 = arith.constant 0 : index
    %23 = vector.load %arg8[%c0_14, %c0_15] : memref<64x64xf32, #tpu.memory_space<vmem>>, vector<64x64xf32>
    %cst_16 = arith.constant dense<0.000000e+00> : vector<256x64xf32>
    %24 = tpu.matmul %22, %23, %cst_16 {dimension_numbers = #tpu.dot_dimension_numbers<[1], [0], [0], [1], [0, 0, 1, 1], [], []>} : vector<256x64xf32>, vector<64x64xf32>, vector<256x64xf32> -> vector<256x64xf32>
    %c0_17 = arith.constant 0 : index
    %c0_18 = arith.constant 0 : index
    %25 = vector.load %arg9[%c0_17, %c0_18] : memref<1x64xf32, #tpu.memory_space<vmem>>, vector<1x64xf32>
    %26 = vector.broadcast %25 : vector<1x64xf32> to vector<256x64xf32>
    %27 = arith.addf %24, %26 : vector<256x64xf32>
    %28 = math.tanh %27 : vector<256x64xf32>
    %29 = arith.addf %28, %22 : vector<256x64xf32>
    %c0_19 = arith.constant 0 : index
    %c0_20 = arith.constant 0 : index
    %30 = vector.load %arg10[%c0_19, %c0_20] : memref<64x128xf32, #tpu.memory_space<vmem>>, vector<64x128xf32>
    %cst_21 = arith.constant dense<0.000000e+00> : vector<256x128xf32>
    %31 = tpu.matmul %29, %30, %cst_21 {dimension_numbers = #tpu.dot_dimension_numbers<[1], [0], [0], [1], [0, 0, 1, 1], [], []>} : vector<256x64xf32>, vector<64x128xf32>, vector<256x128xf32> -> vector<256x128xf32>
    %c0_22 = arith.constant 0 : index
    %c0_23 = arith.constant 0 : index
    %32 = vector.load %arg11[%c0_22, %c0_23] : memref<1x128xf32, #tpu.memory_space<vmem>>, vector<1x128xf32>
    %33 = vector.broadcast %32 : vector<1x128xf32> to vector<256x128xf32>
    %34 = arith.addf %31, %33 : vector<256x128xf32>
    %35 = arith.index_cast %1 : i32 to index
    %c0_24 = arith.constant 0 : index
    %36 = vector.load %arg12[%35, %c0_24] : memref<256x128xf32, #tpu.memory_space<vmem>>, vector<256x128xf32>
    tpu.vector_store %arg12[%35, %c0_24], %34 {strides = array<i32>} : memref<256x128xf32, #tpu.memory_space<vmem>>, vector<256x128xf32>,
    %c1_i32 = arith.constant 1 : i32
    return
  }
  func.func @transform_0(%arg0: i32) -> (i32, i32) {
    %c0_i32 = arith.constant 0 : i32
    %c0_i32_0 = arith.constant 0 : i32
    return %arg0, %c0_i32 : i32, i32
  }
  func.func @transform_1(%arg0: i32) -> (i32, i32) {
    %c0_i32 = arith.constant 0 : i32
    %c0_i32_0 = arith.constant 0 : i32
    %c0_i32_1 = arith.constant 0 : i32
    return %c0_i32, %c0_i32_0 : i32, i32
  }
  func.func @transform_2(%arg0: i32) -> (i32, i32) {
    %c0_i32 = arith.constant 0 : i32
    %c0_i32_0 = arith.constant 0 : i32
    %c0_i32_1 = arith.constant 0 : i32
    return %c0_i32, %c0_i32_0 : i32, i32
  }
  func.func @transform_3(%arg0: i32) -> (i32, i32) {
    %c0_i32 = arith.constant 0 : i32
    %c0_i32_0 = arith.constant 0 : i32
    %c0_i32_1 = arith.constant 0 : i32
    return %c0_i32, %c0_i32_0 : i32, i32
  }
  func.func @transform_4(%arg0: i32) -> (i32, i32) {
    %c0_i32 = arith.constant 0 : i32
    %c0_i32_0 = arith.constant 0 : i32
    %c0_i32_1 = arith.constant 0 : i32
    return %c0_i32, %c0_i32_0 : i32, i32
  }
  func.func @transform_5(%arg0: i32) -> (i32, i32) {
    %c0_i32 = arith.constant 0 : i32
    %c0_i32_0 = arith.constant 0 : i32
    %c0_i32_1 = arith.constant 0 : i32
    return %c0_i32, %c0_i32_0 : i32, i32
  }
  func.func @transform_6(%arg0: i32) -> (i32, i32) {
    %c0_i32 = arith.constant 0 : i32
    %c0_i32_0 = arith.constant 0 : i32
    %c0_i32_1 = arith.constant 0 : i32
    return %c0_i32, %c0_i32_0 : i32, i32
  }
  func.func @transform_7(%arg0: i32) -> (i32, i32) {
    %c0_i32 = arith.constant 0 : i32
    %c0_i32_0 = arith.constant 0 : i32
    %c0_i32_1 = arith.constant 0 : i32
    return %c0_i32, %c0_i32_0 : i32, i32
  }
  func.func @transform_8(%arg0: i32) -> (i32, i32) {
    %c0_i32 = arith.constant 0 : i32
    %c0_i32_0 = arith.constant 0 : i32
    %c0_i32_1 = arith.constant 0 : i32
    return %c0_i32, %c0_i32_0 : i32, i32
  }
  func.func @transform_9(%arg0: i32) -> (i32, i32) {
    %c0_i32 = arith.constant 0 : i32
    %c0_i32_0 = arith.constant 0 : i32
    %c0_i32_1 = arith.constant 0 : i32
    return %c0_i32, %c0_i32_0 : i32, i32
  }
  func.func @transform_10(%arg0: i32) -> (i32, i32) {
    %c0_i32 = arith.constant 0 : i32
    %c0_i32_0 = arith.constant 0 : i32
    %c0_i32_1 = arith.constant 0 : i32
    return %c0_i32, %c0_i32_0 : i32, i32
  }
  func.func @transform_11(%arg0: i32) -> (i32, i32) {
    %c0_i32 = arith.constant 0 : i32
    %c0_i32_0 = arith.constant 0 : i32
    return %arg0, %c0_i32 : i32, i32
  }
}

</mosaic_0001>

<bundles_post_ra>
// kernel: tpu_custom_call.1
= control target key start
LH: loop header
LB: loop body
LE: loop exit
PB: predicated region body
PF: predicated region fallthrough
CT: control target
= control target key end

     0   :  { %vm81_vm0 = vcmask 162816   ;;  %vm178_vm1 = vcmask 1043456   ;;  %s3965_s0 = inlined_call_operand.vmem [shape: f32[256,20], index: 0, kind: input, shape index: {}]   ;;  %s3966_s1 = inlined_call_operand.vmem [shape: f32[20,64], index: 1, kind: input, shape index: {}]   ;;  %s3967_s2 = inlined_call_operand.vmem [shape: f32[1,64], index: 2, kind: input, shape index: {}]   ;;  %s3968_s3 = inlined_call_operand.vmem [shape: f32[64,64], index: 3, kind: input, shape index: {}]   ;;  %s3969_s4 = inlined_call_operand.vmem [shape: f32[1,64], index: 4, kind: input, shape index: {}]   ;;  %s3970_s5 = inlined_call_operand.vmem [shape: f32[64,64], index: 5, kind: input, shape index: {}]   ;;  %s3971_s6 = inlined_call_operand.vmem [shape: f32[1,64], index: 6, kind: input, shape index: {}]   ;;  %s3972_s7 = inlined_call_operand.vmem [shape: f32[64,64], index: 7, kind: input, shape index: {}]   ;;  %s3973_s8 = inlined_call_operand.vmem [shape: f32[1,64], index: 8, kind: input, shape index: {}]   ;;  %s3974_s9 = inlined_call_operand.vmem [shape: f32[64,128], index: 9, kind: input, shape index: {}]   ;;  %s3975_s10 = inlined_call_operand.vmem [shape: f32[1,128], index: 10, kind: input, shape index: {}]   ;;  %s3976_s11 = inlined_call_operand.hbm [shape: f32[256,128], index: 11, kind: output, shape index: {}]  }
   0x1   :  { %v71_v0 = vld [vmem:[%s3966_s1] sm:$0xff]  ;;  %v72_v1 = vld [vmem:[%s3966_s1 + $0x8] sm:$0xff]  ;;  %v73_v4 = vld [vmem:[%s3966_s1 + $0x10] sm:$0xf] }
   0x2   :  { %v2663_v2 = vpack.c.bf16 %v72_v1, %v71_v0  ;;  %v39_v3 = vld [vmem:[%s3965_s0] sm:$0xff]  ;;  %v40_v5 = vld [vmem:[%s3965_s0 + $0x8] sm:$0xff]  ;;  %v41_v8 = vld [vmem:[%s3965_s0 + $0x10] sm:$0xff] }
   0x3   :  { %2359 = vmatprep.mubr.msk.f32.mxu0 %vm81_vm0, %v39_v3  ;;  %v55_v6 = vld [vmem:[%s3965_s0 + $0x80] sm:$0xff]  ;;  %v56_v7 = vld [vmem:[%s3965_s0 + $0x88] sm:$0xff]  ;;  %v57_v9 = vld [vmem:[%s3965_s0 + $0x90] sm:$0xff] }
   0x4   :  { %2664 = vmatprep.subr.bf16.mxu0 %v2663_v2  ;;  %2731 = vmatprep.subr.bf16.mxu1 %v2663_v2  ;;  %v42_v10 = vld [vmem:[%s3965_s0 + $0x18] sm:$0xff]  ;;  %v43_v12 = vld [vmem:[%s3965_s0 + $0x20] sm:$0xff]  ;;  %v408_v15 = vld [vmem:[%s3968_s3 + $0x8] sm:$0xff] }
   0x5   :  { %2666 = vmatpush3.bf16.msra.mxu0 %v2663_v2  ;;  %2733 = vmatpush3.bf16.msra.mxu1 %v2663_v2  ;;  %v58_v11 = vld [vmem:[%s3965_s0 + $0x98] sm:$0xff]  ;;  %v59_v13 = vld [vmem:[%s3965_s0 + $0xa0] sm:$0xff]  ;;  %v409_v16 = vld [vmem:[%s3968_s3 + $0x10] sm:$0xff] }
   0x6   :  { %2357 = vmatprep.subr.msk.mxu0 %vm178_vm1, %v73_v4  ;;  %2732 = vmatprep.subr.msk.mxu1 %vm178_vm1, %v73_v4  ;;  %v407_v14 = vld [vmem:[%s3968_s3] sm:$0xff]  ;;  %v410_v17 = vld [vmem:[%s3968_s3 + $0x18] sm:$0xff]  ;;  %v44_v19 = vld [vmem:[%s3965_s0 + $0x28] sm:$0xff] }
   0x7   :  { %2383 = vmatprep.mubr.msk.f32.mxu1 %vm81_vm0, %v55_v6  ;;  %v2667_v18 = vpack.c.bf16 %v408_v15, %v407_v14  ;;  %v60_v20 = vld [vmem:[%s3965_s0 + $0xa8] sm:$0xff] }
   0x9   :  { %2358 = vmatpush3.msk.msra.mxu0 %vm178_vm1, %v73_v4  ;;  %2734 = vmatpush3.msk.msra.mxu1 %vm178_vm1, %v73_v4 }
   0xa   :  { %2360 = vmatmul.mubr.msk.f32.vlgmr.msra.gmra.mrb[0].mxu0 %vm81_vm0, %v40_v5  ;;  %2384 = vmatmul.mubr.msk.f32.vlgmr.msra.gmra.mrb[0].mxu1 %vm81_vm0, %v56_v7 }
   0xb   :  { %2362 = vmatprep.mubr.msk.f32.mxu0 %vm81_vm0, %v41_v8  ;;  %2386 = vmatprep.mubr.msk.f32.mxu1 %vm81_vm0, %v57_v9 }
   0xe   :  { %2363 = vmatmul.mubr.msk.f32.gmra.mrb[2].mxu0 %vm81_vm0, %v42_v10  ;;  %2387 = vmatmul.mubr.msk.f32.gmra.mrb[2].mxu1 %vm81_vm0, %v58_v11 }
   0xf   :  { %2365 = vmatprep.mubr.msk.f32.mxu0 %vm81_vm0, %v43_v12  ;;  %2389 = vmatprep.mubr.msk.f32.mxu1 %vm81_vm0, %v59_v13 }
  0x10   :  { %16 = vsyncpa [#allocation3], 0  ;;  %v45_v21 = vld [vmem:[%s3965_s0 + $0x30] sm:$0xff]  ;;  %2668 = vmatprep.subr.bf16.mxu1 %v2667_v18  ;;  %v2671_v23 = vpack.c.bf16 %v410_v17, %v409_v16  ;;  %v411_v24 = vld [vmem:[%s3968_s3 + $0x20] sm:$0xff]  ;;  %vm422_vm2 = vcmask 523264  }
  0x11   :  { %v61_v22 = vld [vmem:[%s3965_s0 + $0xb0] sm:$0xff]  ;;  %2670 = vmatpush3.bf16.msra.mxu1 %v2667_v18  ;;  %v412_v25 = vld [vmem:[%s3968_s3 + $0x28] sm:$0xff]  ;;  %v46_v26 = vld [vmem:[%s3965_s0 + $0x38] sm:$0xff] }
  0x12   :  { %2366 = vmatmul.mubr.msk.f32.gmra.mrb[4].mxu0 %vm81_vm0, %v44_v19  ;;  %2390 = vmatmul.mubr.msk.f32.gmra.mrb[4].mxu1 %vm81_vm0, %v60_v20  ;;  %v62_v27 = vld [vmem:[%s3965_s0 + $0xb8] sm:$0xff]  ;;  %v47_v28 = vld [vmem:[%s3965_s0 + $0x40] sm:$0xff]  ;;  %v2675_v30 = vpack.c.bf16 %v412_v25, %v411_v24  ;;  %v413_v31 = vld [vmem:[%s3968_s3 + $0x30] sm:$0xff] }
  0x13   :  { %2368 = vmatprep.mubr.msk.f32.mxu0 %vm81_vm0, %v45_v21  ;;  %2392 = vmatprep.mubr.msk.f32.mxu1 %vm81_vm0, %v61_v22  ;;  %v63_v29 = vld [vmem:[%s3965_s0 + $0xc0] sm:$0xff]  ;;  %v414_v32 = vld [vmem:[%s3968_s3 + $0x38] sm:$0xff]  ;;  %v48_v33 = vld [vmem:[%s3965_s0 + $0x48] sm:$0xff] }
  0x14   :  { %2672 = vmatprep.subr.bf16.mxu1 %v2671_v23  ;;  %v64_v34 = vld [vmem:[%s3965_s0 + $0xc8] sm:$0xff]  ;;  %v49_v35 = vld [vmem:[%s3965_s0 + $0x50] sm:$0xff]  ;;  %v2679_v37 = vpack.c.bf16 %v414_v32, %v413_v31  ;;  %v50_v38 = vld [vmem:[%s3965_s0 + $0x58] sm:$0xff] }
  0x15   :  { %2674 = vmatpush3.bf16.msra.mxu1 %v2671_v23  ;;  %v65_v36 = vld [vmem:[%s3965_s0 + $0xd0] sm:$0xff]  ;;  %v66_v39 = vld [vmem:[%s3965_s0 + $0xd8] sm:$0xff]  ;;  %v51_v40 = vld [vmem:[%s3965_s0 + $0x60] sm:$0xff] }
  0x16   :  { %2369 = vmatmul.mubr.msk.f32.gmra.mrb[6].mxu0 %vm81_vm0, %v46_v26  ;;  %2393 = vmatmul.mubr.msk.f32.gmra.mrb[6].mxu1 %vm81_vm0, %v62_v27  ;;  %v67_v41 = vld [vmem:[%s3965_s0 + $0xe0] sm:$0xff]  ;;  %v52_v42 = vld [vmem:[%s3965_s0 + $0x68] sm:$0xff]  ;;  %v53_v44 = vld [vmem:[%s3965_s0 + $0x70] sm:$0xff] }
  0x17   :  { %2371 = vmatprep.mubr.msk.f32.mxu0 %vm81_vm0, %v47_v28  ;;  %2395 = vmatprep.mubr.msk.f32.mxu1 %vm81_vm0, %v63_v29  ;;  %v68_v43 = vld [vmem:[%s3965_s0 + $0xe8] sm:$0xff]  ;;  %v69_v45 = vld [vmem:[%s3965_s0 + $0xf0] sm:$0xff]  ;;  %v54_v46 = vld [vmem:[%s3965_s0 + $0x78] sm:$0xff] }
  0x18   :  { %2676 = vmatprep.subr.bf16.mxu1 %v2675_v30  ;;  %v70_v47 = vld [vmem:[%s3965_s0 + $0xf8] sm:$0xff]  ;;  %v808_v48 = vld [vmem:[%s3970_s5] sm:$0xff]  ;;  %v809_v49 = vld [vmem:[%s3970_s5 + $0x8] sm:$0xff] }
  0x19   :  { %2678 = vmatpush3.bf16.msra.mxu1 %v2675_v30  ;;  %v810_v50 = vld [vmem:[%s3970_s5 + $0x10] sm:$0xff]  ;;  %v2683_v51 = vpack.c.bf16 %v809_v49, %v808_v48  ;;  %v811_v52 = vld [vmem:[%s3970_s5 + $0x18] sm:$0xff]  ;;  %v3193_v54 = vld [vmem:[%s3967_s2] ss:$0 sm:$0xff] }
  0x1a   :  { %2372 = vmatmul.mubr.msk.f32.gmra.mrb[8].mxu0 %vm81_vm0, %v48_v33  ;;  %2396 = vmatmul.mubr.msk.f32.gmra.mrb[8].mxu1 %vm81_vm0, %v64_v34  ;;  %v2687_v53 = vpack.c.bf16 %v811_v52, %v810_v50 }
  0x1b   :  { %2374 = vmatprep.mubr.msk.f32.mxu0 %vm81_vm0, %v49_v35  ;;  %2398 = vmatprep.mubr.msk.f32.mxu1 %vm81_vm0, %v65_v36 }
  0x1c   :  { %2680 = vmatprep.subr.bf16.mxu1 %v2679_v37  ;;  %2684 = vmatprep.subr.bf16.mxu0 %v2683_v51 }
  0x1d   :  { %2682 = vmatpush3.bf16.msra.mxu1 %v2679_v37  ;;  %2686 = vmatpush3.bf16.msra.mxu0 %v2683_v51 }
  0x1e   :  { %2375 = vmatmul.mubr.msk.f32.gmra.mrb[10].mxu0 %vm81_vm0, %v50_v38  ;;  %2399 = vmatmul.mubr.msk.f32.gmra.mrb[10].mxu1 %vm81_vm0, %v66_v39 }
  0x1f   :  { %2377 = vmatprep.mubr.msk.f32.mxu0 %vm81_vm0, %v51_v40  ;;  %2401 = vmatprep.mubr.msk.f32.mxu1 %vm81_vm0, %v67_v41 }
  0x20   :  { %2688 = vmatprep.subr.bf16.mxu0 %v2687_v53 }
  0x21   :  { %2690 = vmatpush3.bf16.msra.mxu0 %v2687_v53 }
  0x22   :  { %2378 = vmatmul.mubr.msk.f32.gmra.mrb[12].mxu0 %vm81_vm0, %v52_v42  ;;  %2402 = vmatmul.mubr.msk.f32.gmra.mrb[12].mxu1 %vm81_vm0, %v68_v43 }
  0x23   :  { %2380 = vmatprep.mubr.msk.f32.mxu0 %vm81_vm0, %v53_v44  ;;  %2404 = vmatprep.mubr.msk.f32.mxu1 %vm81_vm0, %v69_v45 }
  0x26   :  { %2381 = vmatmul.mubr.msk.f32.gmra.mrb[14].mxu0 %vm81_vm0, %v54_v46  ;;  %2405 = vmatmul.mubr.msk.f32.gmra.mrb[14].mxu1 %vm81_vm0, %v70_v47 }
  0xdd   :  { %v2361_v55 = vpop.f32.mrb[0].mxu0  ;;  %v3195_v56 = vpop.f32.mrb[0].mxu1 }
  0xde   :  { %v248_v57 = vpop.f32.mrb[1].mxu0  ;;  %v328_v58 = vpop.f32.mrb[1].mxu1  ;;  %v3201_v60 = vadd.f32 %v2361_v55, %v3193_v54  ;;  %v3289_v41 = vadd.f32 %v3195_v56, %v3193_v54  ;;  %v812_v56 = vld [vmem:[%s3970_s5 + $0x20] sm:$0xff] }
  0xdf   :  { %v3198_v59 = vadd.f32 %v3193_v54, %v248_v57  ;;  %v3273_v38 = vadd.f32 %v3193_v54, %v328_v58  ;;  %v813_v57 = vld [vmem:[%s3970_s5 + $0x28] sm:$0xff] }
  0xe0   :  { %v2691_v58 = vpack.c.bf16 %v813_v57, %v812_v56 }
  0xe1   :  { %v2364_v61 = vpop.f32.mrb[2].mxu0  ;;  %2423 = vmatprep.mubr.msk.f32.mxu1 %vm422_vm2, %v3198_v59  ;;  %v3205_v62 = vpop.f32.mrb[2].mxu1 }
  0xe2   :  { %v258_v63 = vpop.f32.mrb[3].mxu0  ;;  %2424 = vmatmul.mubr.msk.f32.vlgmr.msra.gmra.mrb[16].mxu1 %vm422_vm2, %v3201_v60  ;;  %v338_v0 = vpop.f32.mrb[3].mxu1  ;;  %v3213_v2 = vadd.f32 %v2364_v61, %v3193_v54  ;;  %v3300_v43 = vadd.f32 %v3205_v62, %v3193_v54  ;;  %2692 = vmatprep.subr.bf16.mxu0 %v2691_v58  ;;  %v814_v61 = vld [vmem:[%s3970_s5 + $0x30] sm:$0xff] }
  0xe3   :  { %v3210_v1 = vadd.f32 %v3193_v54, %v258_v63  ;;  %v3285_v40 = vadd.f32 %v3193_v54, %v338_v0  ;;  %2694 = vmatpush3.bf16.msra.mxu0 %v2691_v58  ;;  %v1208_v63 = vld [vmem:[%s3972_s7] sm:$0xff]  ;;  %v1209_v0 = vld [vmem:[%s3972_s7 + $0x8] sm:$0xff] }
  0xe5   :  { %v2367_v3 = vpop.f32.mrb[4].mxu0  ;;  %2426 = vmatprep.mubr.msk.f32.mxu1 %vm422_vm2, %v3210_v1  ;;  %v2391_v4 = vpop.f32.mrb[4].mxu1 }
  0xe6   :  { %v268_v5 = vpop.f32.mrb[5].mxu0  ;;  %2427 = vmatmul.mubr.msk.f32.gmra.mrb[18].mxu1 %vm422_vm2, %v3213_v2  ;;  %v348_v6 = vpop.f32.mrb[5].mxu1  ;;  %v3223_v8 = vadd.f32 %v2367_v3, %v3193_v54  ;;  %v3310_v45 = vadd.f32 %v2391_v4, %v3193_v54  ;;  %v1210_v3 = vld [vmem:[%s3972_s7 + $0x10] sm:$0xff]  ;;  %v2699_v4 = vpack.c.bf16 %v1209_v0, %v1208_v63 }
  0xe7   :  { %v3220_v7 = vadd.f32 %v3193_v54, %v268_v5  ;;  %v3296_v42 = vadd.f32 %v3193_v54, %v348_v6  ;;  %v1211_v5 = vld [vmem:[%s3972_s7 + $0x18] sm:$0xff] }
  0xe8   :  { %v2703_v6 = vpack.c.bf16 %v1211_v5, %v1210_v3  ;;  %2700 = vmatprep.subr.bf16.mxu1 %v2699_v4 }
  0xe9   :  { %v2370_v9 = vpop.f32.mrb[6].mxu0  ;;  %2429 = vmatprep.mubr.msk.f32.mxu1 %vm422_vm2, %v3220_v7  ;;  %v2394_v10 = vpop.f32.mrb[6].mxu1  ;;  %2702 = vmatpush3.bf16.msra.mxu1 %v2699_v4 }
  0xea   :  { %v278_v11 = vpop.f32.mrb[7].mxu0  ;;  %2430 = vmatmul.mubr.msk.f32.gmra.mrb[20].mxu1 %vm422_vm2, %v3223_v8  ;;  %v358_v12 = vpop.f32.mrb[7].mxu1  ;;  %v3233_v14 = vadd.f32 %v2370_v9, %v3193_v54  ;;  %v3320_v47 = vadd.f32 %v2394_v10, %v3193_v54  ;;  %v1212_v9 = vld [vmem:[%s3972_s7 + $0x20] sm:$0xff]  ;;  %v1213_v10 = vld [vmem:[%s3972_s7 + $0x28] sm:$0xff]  ;;  %2704 = vmatprep.subr.bf16.mxu1 %v2703_v6 }
  0xeb   :  { %v3230_v13 = vadd.f32 %v3193_v54, %v278_v11  ;;  %v3307_v44 = vadd.f32 %v3193_v54, %v358_v12  ;;  %v2707_v11 = vpack.c.bf16 %v1213_v10, %v1212_v9  ;;  %v3394_v12 = vld [vmem:[%s3969_s4] ss:$0 sm:$0xff] }
  0xed   :  { %v2373_v15 = vpop.f32.mrb[8].mxu0  ;;  %2432 = vmatprep.mubr.msk.f32.mxu1 %vm422_vm2, %v3230_v13  ;;  %v2397_v16 = vpop.f32.mrb[8].mxu1  ;;  %2706 = vmatpush3.bf16.msra.mxu1 %v2703_v6 }
  0xee   :  { %v288_v17 = vpop.f32.mrb[9].mxu0  ;;  %2433 = vmatmul.mubr.msk.f32.gmra.mrb[22].mxu1 %vm422_vm2, %v3233_v14  ;;  %v368_v18 = vpop.f32.mrb[9].mxu1  ;;  %v3243_v20 = vadd.f32 %v2373_v15, %v3193_v54  ;;  %v3330_v49 = vadd.f32 %v2397_v16, %v3193_v54  ;;  %2708 = vmatprep.subr.bf16.mxu1 %v2707_v11 }
  0xef   :  { %v3240_v19 = vadd.f32 %v3193_v54, %v288_v17  ;;  %v3317_v46 = vadd.f32 %v3193_v54, %v368_v18 }
  0xf1   :  { %v2376_v21 = vpop.f32.mrb[10].mxu0  ;;  %2435 = vmatprep.mubr.msk.f32.mxu1 %vm422_vm2, %v3240_v19  ;;  %v2400_v22 = vpop.f32.mrb[10].mxu1  ;;  %2710 = vmatpush3.bf16.msra.mxu1 %v2707_v11 }
  0xf2   :  { %v298_v23 = vpop.f32.mrb[11].mxu0  ;;  %2436 = vmatmul.mubr.msk.f32.gmra.mrb[24].mxu1 %vm422_vm2, %v3243_v20  ;;  %v378_v24 = vpop.f32.mrb[11].mxu1  ;;  %v3253_v26 = vadd.f32 %v2376_v21, %v3193_v54  ;;  %v3340_v51 = vadd.f32 %v2400_v22, %v3193_v54 }
  0xf3   :  { %v3250_v25 = vadd.f32 %v3193_v54, %v298_v23  ;;  %v3327_v48 = vadd.f32 %v3193_v54, %v378_v24 }
  0xf5   :  { %v2379_v27 = vpop.f32.mrb[12].mxu0  ;;  %2438 = vmatprep.mubr.msk.f32.mxu1 %vm422_vm2, %v3250_v25  ;;  %v2403_v28 = vpop.f32.mrb[12].mxu1 }
  0xf6   :  { %v308_v29 = vpop.f32.mrb[13].mxu0  ;;  %2439 = vmatmul.mubr.msk.f32.gmra.mrb[26].mxu1 %vm422_vm2, %v3253_v26  ;;  %v388_v30 = vpop.f32.mrb[13].mxu1  ;;  %v3263_v32 = vadd.f32 %v2379_v27, %v3193_v54  ;;  %v3350_v53 = vadd.f32 %v2403_v28, %v3193_v54 }
  0xf7   :  { %v3260_v31 = vadd.f32 %v3193_v54, %v308_v29  ;;  %v3337_v50 = vadd.f32 %v3193_v54, %v388_v30 }
  0xf9   :  { %v2382_v33 = vpop.f32.mrb[14].mxu0  ;;  %2441 = vmatprep.mubr.msk.f32.mxu1 %vm422_vm2, %v3260_v31  ;;  %v2406_v34 = vpop.f32.mrb[14].mxu1 }
  0xfa   :  { %v318_v35 = vpop.f32.mrb[15].mxu0  ;;  %2442 = vmatmul.mubr.msk.f32.gmra.mrb[28].mxu1 %vm422_vm2, %v3263_v32  ;;  %v398_v36 = vpop.f32.mrb[15].mxu1  ;;  %v3276_v39 = vadd.f32 %v2382_v33, %v3193_v54  ;;  %v3357_v55 = vadd.f32 %v2406_v34, %v3193_v54 }
  0xfb   :  { %v3270_v37 = vadd.f32 %v3193_v54, %v318_v35  ;;  %v3347_v52 = vadd.f32 %v3193_v54, %v398_v36  ;;  %v815_v54 = vld [vmem:[%s3970_s5 + $0x38] sm:$0xff] }
  0xfc   :  { %v2695_v62 = vpack.c.bf16 %v815_v54, %v814_v61 }
  0xfd   :  { %2444 = vmatprep.mubr.msk.f32.mxu1 %vm422_vm2, %v3270_v37 }
  0xfe   :  { %2445 = vmatmul.mubr.msk.f32.gmra.mrb[30].mxu1 %vm422_vm2, %v3276_v39  ;;  %2696 = vmatprep.subr.bf16.mxu0 %v2695_v62 }
  0xff   :  { %2447 = vmatprep.mubr.msk.f32.mxu1 %vm422_vm2, %v3273_v38  ;;  %2698 = vmatpush3.bf16.msra.mxu0 %v2695_v62 }
 0x102   :  { %2448 = vmatmul.mubr.msk.f32.gmra.mrb[32].mxu1 %vm422_vm2, %v3289_v41 }
 0x103   :  { %2450 = vmatprep.mubr.msk.f32.mxu1 %vm422_vm2, %v3285_v40 }
 0x106   :  { %2451 = vmatmul.mubr.msk.f32.gmra.mrb[34].mxu1 %vm422_vm2, %v3300_v43 }
 0x107   :  { %2453 = vmatprep.mubr.msk.f32.mxu1 %vm422_vm2, %v3296_v42 }
 0x10a   :  { %2454 = vmatmul.mubr.msk.f32.gmra.mrb[36].mxu1 %vm422_vm2, %v3310_v45 }
 0x10b   :  { %2456 = vmatprep.mubr.msk.f32.mxu1 %vm422_vm2, %v3307_v44 }
 0x10e   :  { %2457 = vmatmul.mubr.msk.f32.gmra.mrb[38].mxu1 %vm422_vm2, %v3320_v47 }
 0x10f   :  { %2459 = vmatprep.mubr.msk.f32.mxu1 %vm422_vm2, %v3317_v46 }
 0x112   :  { %2460 = vmatmul.mubr.msk.f32.gmra.mrb[40].mxu1 %vm422_vm2, %v3330_v49 }
 0x113   :  { %2462 = vmatprep.mubr.msk.f32.mxu1 %vm422_vm2, %v3327_v48 }
 0x116   :  { %2463 = vmatmul.mubr.msk.f32.gmra.mrb[42].mxu1 %vm422_vm2, %v3340_v51 }
 0x117   :  { %2465 = vmatprep.mubr.msk.f32.mxu1 %vm422_vm2, %v3337_v50 }
 0x11a   :  { %2466 = vmatmul.mubr.msk.f32.gmra.mrb[44].mxu1 %vm422_vm2, %v3350_v53 }
 0x11b   :  { %2468 = vmatprep.mubr.msk.f32.mxu1 %vm422_vm2, %v3347_v52 }
 0x11e   :  { %2469 = vmatmul.mubr.msk.f32.gmra.mrb[46].mxu1 %vm422_vm2, %v3357_v55 }
 0x1b5   :  { %v2425_v15 = vpop.f32.mrb[16].mxu1 }
 0x1b6   :  { %v591_v16 = vadd.f32 %v2425_v15, %v3394_v12  ;;  %v585_v17 = vpop.f32.mrb[17].mxu1 }
 0x1b7   :  { %v586_v18 = vadd.f32 %v3394_v12, %v585_v17 }
 0x1b8   :  { %2738 = vtanh.f32 %v591_v16 }
 0x1b9   :  { %2740 = vtanh.f32 %v586_v18  ;;  %v2428_v21 = vpop.f32.mrb[18].mxu1 }
 0x1ba   :  { %v601_v22 = vadd.f32 %v2428_v21, %v3394_v12  ;;  %v595_v23 = vpop.f32.mrb[19].mxu1 }
 0x1bb   :  { %v596_v24 = vadd.f32 %v3394_v12, %v595_v23 }
 0x1bc   :  { %2742 = vtanh.f32 %v601_v22 }
 0x1bd   :  { %2744 = vtanh.f32 %v596_v24  ;;  %v2431_v27 = vpop.f32.mrb[20].mxu1 }
 0x1be   :  { %v611_v28 = vadd.f32 %v2431_v27, %v3394_v12  ;;  %v605_v29 = vpop.f32.mrb[21].mxu1 }
 0x1bf   :  { %v606_v30 = vadd.f32 %v3394_v12, %v605_v29 }
 0x1c0   :  { %2746 = vtanh.f32 %v611_v28 }
 0x1c1   :  { %2748 = vtanh.f32 %v606_v30  ;;  %v2434_v33 = vpop.f32.mrb[22].mxu1 }
 0x1c2   :  { %v2739_v34 = vpop.eup %2738  ;;  %v621_v35 = vadd.f32 %v2434_v33, %v3394_v12  ;;  %v615_v36 = vpop.f32.mrb[23].mxu1 }
 0x1c3   :  { %v2741_v56 = vpop.eup %2740  ;;  %v616_v57 = vadd.f32 %v3394_v12, %v615_v36  ;;  %v3408_v61 = vadd.f32 %v2739_v34, %v3201_v60 }
 0x1c4   :  { %2750 = vtanh.f32 %v621_v35  ;;  %v3405_v58 = vadd.f32 %v2741_v56, %v3198_v59 }
 0x1c5   :  { %2752 = vtanh.f32 %v616_v57  ;;  %v2437_v54 = vpop.f32.mrb[24].mxu1 }
 0x1c6   :  { %v2743_v62 = vpop.eup %2742  ;;  %v631_v63 = vadd.f32 %v2437_v54, %v3394_v12  ;;  %v625_v0 = vpop.f32.mrb[25].mxu1  ;;  %2487 = vmatprep.mubr.msk.f32.mxu0 %vm422_vm2, %v3405_v58 }
 0x1c7   :  { %v2745_v3 = vpop.eup %2744  ;;  %v626_v4 = vadd.f32 %v3394_v12, %v625_v0  ;;  %2488 = vmatmul.mubr.msk.f32.vlgmr.msra.gmra.mrb[16].mxu0 %vm422_vm2, %v3408_v61  ;;  %v3420_v5 = vadd.f32 %v2743_v62, %v3213_v2 }
 0x1c8   :  { %2754 = vtanh.f32 %v631_v63  ;;  %v3417_v59 = vadd.f32 %v2745_v3, %v3210_v1 }
 0x1c9   :  { %2756 = vtanh.f32 %v626_v4  ;;  %v2440_v60 = vpop.f32.mrb[26].mxu1 }
 0x1ca   :  { %v2747_v6 = vpop.eup %2746  ;;  %v641_v9 = vadd.f32 %v2440_v60, %v3394_v12  ;;  %v635_v10 = vpop.f32.mrb[27].mxu1  ;;  %2490 = vmatprep.mubr.msk.f32.mxu0 %vm422_vm2, %v3417_v59 }
 0x1cb   :  { %v2749_v11 = vpop.eup %2748  ;;  %v636_v15 = vadd.f32 %v3394_v12, %v635_v10  ;;  %2491 = vmatmul.mubr.msk.f32.gmra.mrb[18].mxu0 %vm422_vm2, %v3420_v5  ;;  %v3432_v16 = vadd.f32 %v2747_v6, %v3223_v8 }
 0x1cc   :  { %2758 = vtanh.f32 %v641_v9  ;;  %v3429_v1 = vadd.f32 %v2749_v11, %v3220_v7 }
 0x1cd   :  { %2760 = vtanh.f32 %v636_v15  ;;  %v2443_v2 = vpop.f32.mrb[28].mxu1 }
 0x1ce   :  { %v2751_v17 = vpop.eup %2750  ;;  %v651_v18 = vadd.f32 %v2443_v2, %v3394_v12  ;;  %v645_v21 = vpop.f32.mrb[29].mxu1  ;;  %2493 = vmatprep.mubr.msk.f32.mxu0 %vm422_vm2, %v3429_v1 }
 0x1cf   :  { %v2753_v22 = vpop.eup %2752  ;;  %v646_v23 = vadd.f32 %v3394_v12, %v645_v21  ;;  %2494 = vmatmul.mubr.msk.f32.gmra.mrb[20].mxu0 %vm422_vm2, %v3432_v16  ;;  %v3444_v24 = vadd.f32 %v2751_v17, %v3233_v14 }
 0x1d0   :  { %2762 = vtanh.f32 %v651_v18  ;;  %v3441_v7 = vadd.f32 %v2753_v22, %v3230_v13 }
 0x1d1   :  { %2764 = vtanh.f32 %v646_v23  ;;  %v2446_v8 = vpop.f32.mrb[30].mxu1 }
 0x1d2   :  { %v2755_v27 = vpop.eup %2754  ;;  %v661_v28 = vadd.f32 %v2446_v8, %v3394_v12  ;;  %v655_v29 = vpop.f32.mrb[31].mxu1  ;;  %2496 = vmatprep.mubr.msk.f32.mxu0 %vm422_vm2, %v3441_v7 }
 0x1d3   :  { %v2757_v30 = vpop.eup %2756  ;;  %v656_v33 = vadd.f32 %v3394_v12, %v655_v29  ;;  %2497 = vmatmul.mubr.msk.f32.gmra.mrb[22].mxu0 %vm422_vm2, %v3444_v24  ;;  %v3456_v34 = vadd.f32 %v2755_v27, %v3243_v20 }
 0x1d4   :  { %2766 = vtanh.f32 %v661_v28  ;;  %v3453_v13 = vadd.f32 %v2757_v30, %v3240_v19 }
 0x1d5   :  { %2768 = vtanh.f32 %v656_v33  ;;  %v2449_v14 = vpop.f32.mrb[32].mxu1 }
 0x1d6   :  { %v2759_v35 = vpop.eup %2758  ;;  %v671_v36 = vadd.f32 %v2449_v14, %v3394_v12  ;;  %v665_v56 = vpop.f32.mrb[33].mxu1  ;;  %2499 = vmatprep.mubr.msk.f32.mxu0 %vm422_vm2, %v3453_v13 }
 0x1d7   :  { %v2761_v57 = vpop.eup %2760  ;;  %v666_v54 = vadd.f32 %v3394_v12, %v665_v56  ;;  %2500 = vmatmul.mubr.msk.f32.gmra.mrb[24].mxu0 %vm422_vm2, %v3456_v34  ;;  %v3468_v62 = vadd.f32 %v2759_v35, %v3253_v26 }
 0x1d8   :  { %2770 = vtanh.f32 %v671_v36  ;;  %v3465_v19 = vadd.f32 %v2761_v57, %v3250_v25 }
 0x1d9   :  { %2772 = vtanh.f32 %v666_v54  ;;  %v2452_v20 = vpop.f32.mrb[34].mxu1 }
 0x1da   :  { %v2763_v63 = vpop.eup %2762  ;;  %v681_v0 = vadd.f32 %v2452_v20, %v3394_v12  ;;  %v675_v3 = vpop.f32.mrb[35].mxu1  ;;  %2502 = vmatprep.mubr.msk.f32.mxu0 %vm422_vm2, %v3465_v19 }
 0x1db   :  { %v2765_v4 = vpop.eup %2764  ;;  %v676_v60 = vadd.f32 %v3394_v12, %v675_v3  ;;  %2503 = vmatmul.mubr.msk.f32.gmra.mrb[26].mxu0 %vm422_vm2, %v3468_v62  ;;  %v3480_v6 = vadd.f32 %v2763_v63, %v3263_v32 }
 0x1dc   :  { %2774 = vtanh.f32 %v681_v0  ;;  %v3477_v25 = vadd.f32 %v2765_v4, %v3260_v31 }
 0x1dd   :  { %2776 = vtanh.f32 %v676_v60  ;;  %v2455_v26 = vpop.f32.mrb[36].mxu1 }
 0x1de   :  { %v2767_v9 = vpop.eup %2766  ;;  %v691_v10 = vadd.f32 %v2455_v26, %v3394_v12  ;;  %v685_v11 = vpop.f32.mrb[37].mxu1  ;;  %2505 = vmatprep.mubr.msk.f32.mxu0 %vm422_vm2, %v3477_v25 }
 0x1df   :  { %v2769_v15 = vpop.eup %2768  ;;  %v686_v2 = vadd.f32 %v3394_v12, %v685_v11  ;;  %2506 = vmatmul.mubr.msk.f32.gmra.mrb[28].mxu0 %vm422_vm2, %v3480_v6  ;;  %v3492_v17 = vadd.f32 %v2767_v9, %v3276_v39 }
 0x1e0   :  { %2778 = vtanh.f32 %v691_v10  ;;  %v3489_v31 = vadd.f32 %v2769_v15, %v3270_v37 }
 0x1e1   :  { %2780 = vtanh.f32 %v686_v2  ;;  %v2458_v32 = vpop.f32.mrb[38].mxu1 }
 0x1e2   :  { %v2771_v18 = vpop.eup %2770  ;;  %v701_v21 = vadd.f32 %v2458_v32, %v3394_v12  ;;  %v695_v22 = vpop.f32.mrb[39].mxu1  ;;  %2508 = vmatprep.mubr.msk.f32.mxu0 %vm422_vm2, %v3489_v31 }
 0x1e3   :  { %v2773_v23 = vpop.eup %2772  ;;  %v696_v8 = vadd.f32 %v3394_v12, %v695_v22  ;;  %2509 = vmatmul.mubr.msk.f32.gmra.mrb[30].mxu0 %vm422_vm2, %v3492_v17  ;;  %v3504_v27 = vadd.f32 %v2771_v18, %v3289_v41 }
 0x1e4   :  { %2782 = vtanh.f32 %v701_v21  ;;  %v3501_v37 = vadd.f32 %v2773_v23, %v3273_v38 }
 0x1e5   :  { %2784 = vtanh.f32 %v696_v8  ;;  %v2461_v39 = vpop.f32.mrb[40].mxu1 }
 0x1e6   :  { %v2775_v28 = vpop.eup %2774  ;;  %v711_v29 = vadd.f32 %v2461_v39, %v3394_v12  ;;  %v705_v30 = vpop.f32.mrb[41].mxu1  ;;  %2511 = vmatprep.mubr.msk.f32.mxu0 %vm422_vm2, %v3501_v37 }
 0x1e7   :  { %v2777_v33 = vpop.eup %2776  ;;  %v706_v14 = vadd.f32 %v3394_v12, %v705_v30  ;;  %2512 = vmatmul.mubr.msk.f32.gmra.mrb[32].mxu0 %vm422_vm2, %v3504_v27  ;;  %v3516_v35 = vadd.f32 %v2775_v28, %v3300_v43  ;;  %v1610_v30 = vld [vmem:[%s3974_s9 + $0x10] sm:$0xff] }
 0x1e8   :  { %2786 = vtanh.f32 %v711_v29  ;;  %v3513_v38 = vadd.f32 %v2777_v33, %v3285_v40 }
 0x1e9   :  { %2788 = vtanh.f32 %v706_v14  ;;  %v2464_v41 = vpop.f32.mrb[42].mxu1  ;;  %v1611_v14 = vld [vmem:[%s3974_s9 + $0x18] sm:$0xff] }
 0x1ea   :  { %v2779_v36 = vpop.eup %2778  ;;  %v721_v56 = vadd.f32 %v2464_v41, %v3394_v12  ;;  %v715_v57 = vpop.f32.mrb[43].mxu1  ;;  %2514 = vmatprep.mubr.msk.f32.mxu0 %vm422_vm2, %v3513_v38  ;;  %v2719_v41 = vpack.c.bf16 %v1611_v14, %v1610_v30 }
 0x1eb   :  { %v2781_v54 = vpop.eup %2780  ;;  %v716_v20 = vadd.f32 %v3394_v12, %v715_v57  ;;  %2515 = vmatmul.mubr.msk.f32.gmra.mrb[34].mxu0 %vm422_vm2, %v3516_v35  ;;  %v3528_v63 = vadd.f32 %v2779_v36, %v3310_v45  ;;  %v1612_v36 = vld [vmem:[%s3974_s9 + $0x20] sm:$0xff] }
 0x1ec   :  { %2790 = vtanh.f32 %v721_v56  ;;  %v3525_v40 = vadd.f32 %v2781_v54, %v3296_v42  ;;  %v1613_v56 = vld [vmem:[%s3974_s9 + $0x28] sm:$0xff]  ;;  %v3615_v54 = vld [vmem:[%s3971_s6] ss:$0 sm:$0xff] }
 0x1ed   :  { %2792 = vtanh.f32 %v716_v20  ;;  %v2467_v43 = vpop.f32.mrb[44].mxu1  ;;  %v2723_v57 = vpack.c.bf16 %v1613_v56, %v1612_v36 }
 0x1ee   :  { %v2783_v0 = vpop.eup %2782  ;;  %v731_v3 = vadd.f32 %v2467_v43, %v3394_v12  ;;  %v725_v4 = vpop.f32.mrb[45].mxu1  ;;  %2517 = vmatprep.mubr.msk.f32.mxu0 %vm422_vm2, %v3525_v40 }
 0x1ef   :  { %v2785_v60 = vpop.eup %2784  ;;  %v726_v26 = vadd.f32 %v3394_v12, %v725_v4  ;;  %2518 = vmatmul.mubr.msk.f32.gmra.mrb[36].mxu0 %vm422_vm2, %v3528_v63  ;;  %v3540_v9 = vadd.f32 %v2783_v0, %v3320_v47 }
 0x1f0   :  { %2794 = vtanh.f32 %v731_v3  ;;  %v3537_v42 = vadd.f32 %v2785_v60, %v3307_v44 }
 0x1f1   :  { %2796 = vtanh.f32 %v726_v26  ;;  %v2470_v45 = vpop.f32.mrb[46].mxu1 }
 0x1f2   :  { %v2787_v10 = vpop.eup %2786  ;;  %v741_v11 = vadd.f32 %v2470_v45, %v3394_v12  ;;  %v735_v15 = vpop.f32.mrb[47].mxu1  ;;  %2520 = vmatprep.mubr.msk.f32.mxu0 %vm422_vm2, %v3537_v42 }
 0x1f3   :  { %v2789_v2 = vpop.eup %2788  ;;  %v736_v32 = vadd.f32 %v3394_v12, %v735_v15  ;;  %2521 = vmatmul.mubr.msk.f32.gmra.mrb[38].mxu0 %vm422_vm2, %v3540_v9  ;;  %v3552_v47 = vadd.f32 %v2787_v10, %v3330_v49 }
 0x1f4   :  { %2798 = vtanh.f32 %v741_v11  ;;  %v3549_v44 = vadd.f32 %v2789_v2, %v3317_v46 }
 0x1f5   :  { %2800 = vtanh.f32 %v736_v32 }
 0x1f6   :  { %v2791_v18 = vpop.eup %2790  ;;  %2523 = vmatprep.mubr.msk.f32.mxu0 %vm422_vm2, %v3549_v44 }
 0x1f7   :  { %v2793_v21 = vpop.eup %2792  ;;  %2524 = vmatmul.mubr.msk.f32.gmra.mrb[40].mxu0 %vm422_vm2, %v3552_v47  ;;  %v3562_v22 = vadd.f32 %v2791_v18, %v3340_v51 }
 0x1f8   :  { %v3559_v12 = vadd.f32 %v2793_v21, %v3327_v48 }
 0x1fa   :  { %v2795_v46 = vpop.eup %2794  ;;  %2526 = vmatprep.mubr.msk.f32.mxu0 %vm422_vm2, %v3559_v12 }
 0x1fb   :  { %v2797_v49 = vpop.eup %2796  ;;  %2527 = vmatmul.mubr.msk.f32.gmra.mrb[42].mxu0 %vm422_vm2, %v3562_v22  ;;  %v3572_v8 = vadd.f32 %v2795_v46, %v3350_v53  ;;  %v1215_v53 = vld [vmem:[%s3972_s7 + $0x38] sm:$0xff] }
 0x1fc   :  { %v3569_v23 = vadd.f32 %v2797_v49, %v3337_v50  ;;  %v1214_v50 = vld [vmem:[%s3972_s7 + $0x30] sm:$0xff] }
 0x1fd   :  { %v2711_v29 = vpack.c.bf16 %v1215_v53, %v1214_v50 }
 0x1fe   :  { %v2799_v39 = vpop.eup %2798  ;;  %2529 = vmatprep.mubr.msk.f32.mxu0 %vm422_vm2, %v3569_v23 }
 0x1ff   :  { %v2801_v48 = vpop.eup %2800  ;;  %2530 = vmatmul.mubr.msk.f32.gmra.mrb[44].mxu0 %vm422_vm2, %v3572_v8  ;;  %v3582_v28 = vadd.f32 %v2799_v39, %v3357_v55  ;;  %2712 = vmatprep.subr.bf16.mxu1 %v2711_v29  ;;  %v1609_v55 = vld [vmem:[%s3974_s9 + $0x8] sm:$0xff] }
 0x200   :  { %v3579_v51 = vadd.f32 %v2801_v48, %v3347_v52  ;;  %2714 = vmatpush3.bf16.msra.mxu1 %v2711_v29  ;;  %v1608_v52 = vld [vmem:[%s3974_s9] sm:$0xff] }
 0x201   :  { %v2715_v33 = vpack.c.bf16 %v1609_v55, %v1608_v52 }
 0x202   :  { %2532 = vmatprep.mubr.msk.f32.mxu0 %vm422_vm2, %v3579_v51 }
 0x203   :  { %2533 = vmatmul.mubr.msk.f32.gmra.mrb[46].mxu0 %vm422_vm2, %v3582_v28  ;;  %2716 = vmatprep.subr.bf16.mxu0 %v2715_v33 }
 0x204   :  { %2718 = vmatpush3.bf16.msra.mxu0 %v2715_v33 }
 0x205   :  { %2720 = vmatprep.subr.bf16.mxu0 %v2719_v41 }
 0x208   :  { %2722 = vmatpush3.bf16.msra.mxu0 %v2719_v41 }
 0x209   :  { %2724 = vmatprep.subr.bf16.mxu0 %v2723_v57 }
 0x20c   :  { %2726 = vmatpush3.bf16.msra.mxu0 %v2723_v57 }
 0x29a   :  { %v2489_v20 = vpop.f32.mrb[16].mxu0 }
 0x29b   :  { %v991_v43 = vadd.f32 %v2489_v20, %v3615_v54  ;;  %v985_v0 = vpop.f32.mrb[17].mxu0 }
 0x29c   :  { %v986_v3 = vadd.f32 %v3615_v54, %v985_v0 }
 0x29d   :  { %2802 = vtanh.f32 %v991_v43 }
 0x29e   :  { %2804 = vtanh.f32 %v986_v3  ;;  %v2492_v4 = vpop.f32.mrb[18].mxu0 }
 0x29f   :  { %v1001_v60 = vadd.f32 %v2492_v4, %v3615_v54  ;;  %v995_v26 = vpop.f32.mrb[19].mxu0 }
 0x2a0   :  { %v996_v45 = vadd.f32 %v3615_v54, %v995_v26 }
 0x2a1   :  { %2806 = vtanh.f32 %v1001_v60 }
 0x2a2   :  { %2808 = vtanh.f32 %v996_v45  ;;  %v2495_v10 = vpop.f32.mrb[20].mxu0 }
 0x2a3   :  { %v1011_v11 = vadd.f32 %v2495_v10, %v3615_v54  ;;  %v1005_v15 = vpop.f32.mrb[21].mxu0 }
 0x2a4   :  { %v1006_v2 = vadd.f32 %v3615_v54, %v1005_v15 }
 0x2a5   :  { %2810 = vtanh.f32 %v1011_v11 }
 0x2a6   :  { %2812 = vtanh.f32 %v1006_v2  ;;  %v2498_v32 = vpop.f32.mrb[22].mxu0 }
 0x2a7   :  { %v2803_v18 = vpop.eup %2802  ;;  %v1021_v21 = vadd.f32 %v2498_v32, %v3615_v54  ;;  %v1015_v46 = vpop.f32.mrb[23].mxu0 }
 0x2a8   :  { %v2805_v49 = vpop.eup %2804  ;;  %v1016_v39 = vadd.f32 %v3615_v54, %v1015_v46  ;;  %v3629_v50 = vadd.f32 %v2803_v18, %v3408_v61 }
 0x2a9   :  { %2814 = vtanh.f32 %v1021_v21  ;;  %v3626_v48 = vadd.f32 %v2805_v49, %v3405_v58 }
 0x2aa   :  { %2816 = vtanh.f32 %v1016_v39  ;;  %v2501_v53 = vpop.f32.mrb[24].mxu0 }
 0x2ab   :  { %v2807_v29 = vpop.eup %2806  ;;  %v1031_v52 = vadd.f32 %v2501_v53, %v3615_v54  ;;  %v1025_v55 = vpop.f32.mrb[25].mxu0  ;;  %2551 = vmatprep.mubr.msk.f32.mxu1 %vm422_vm2, %v3626_v48 }
 0x2ac   :  { %v2809_v30 = vpop.eup %2808  ;;  %v1026_v33 = vadd.f32 %v3615_v54, %v1025_v55  ;;  %2552 = vmatmul.mubr.msk.f32.vlgmr.msra.gmra.mrb[48].mxu1 %vm422_vm2, %v3629_v50  ;;  %v3641_v14 = vadd.f32 %v2807_v29, %v3420_v5 }
 0x2ad   :  { %2818 = vtanh.f32 %v1031_v52  ;;  %v3638_v58 = vadd.f32 %v2809_v30, %v3417_v59 }
 0x2ae   :  { %2820 = vtanh.f32 %v1026_v33  ;;  %v2504_v61 = vpop.f32.mrb[26].mxu0 }
 0x2af   :  { %v2811_v41 = vpop.eup %2810  ;;  %v1041_v36 = vadd.f32 %v2504_v61, %v3615_v54  ;;  %v1035_v56 = vpop.f32.mrb[27].mxu0  ;;  %2554 = vmatprep.mubr.msk.f32.mxu1 %vm422_vm2, %v3638_v58 }
 0x2b0   :  { %v2813_v57 = vpop.eup %2812  ;;  %v1036_v20 = vadd.f32 %v3615_v54, %v1035_v56  ;;  %2555 = vmatmul.mubr.msk.f32.gmra.mrb[50].mxu1 %vm422_vm2, %v3641_v14  ;;  %v3653_v43 = vadd.f32 %v2811_v41, %v3432_v16 }
 0x2b1   :  { %2822 = vtanh.f32 %v1041_v36  ;;  %v3650_v59 = vadd.f32 %v2813_v57, %v3429_v1 }
 0x2b2   :  { %2824 = vtanh.f32 %v1036_v20  ;;  %v2507_v5 = vpop.f32.mrb[28].mxu0 }
 0x2b3   :  { %v2815_v0 = vpop.eup %2814  ;;  %v1051_v3 = vadd.f32 %v2507_v5, %v3615_v54  ;;  %v1045_v4 = vpop.f32.mrb[29].mxu0  ;;  %2557 = vmatprep.mubr.msk.f32.mxu1 %vm422_vm2, %v3650_v59 }
 0x2b4   :  { %v2817_v60 = vpop.eup %2816  ;;  %v1046_v26 = vadd.f32 %v3615_v54, %v1045_v4  ;;  %2558 = vmatmul.mubr.msk.f32.gmra.mrb[52].mxu1 %vm422_vm2, %v3653_v43  ;;  %v3665_v45 = vadd.f32 %v2815_v0, %v3444_v24 }
 0x2b5   :  { %2826 = vtanh.f32 %v1051_v3  ;;  %v3662_v1 = vadd.f32 %v2817_v60, %v3441_v7 }
 0x2b6   :  { %2828 = vtanh.f32 %v1046_v26  ;;  %v2510_v16 = vpop.f32.mrb[30].mxu0 }
 0x2b7   :  { %v2819_v10 = vpop.eup %2818  ;;  %v1061_v11 = vadd.f32 %v2510_v16, %v3615_v54  ;;  %v1055_v15 = vpop.f32.mrb[31].mxu0  ;;  %2560 = vmatprep.mubr.msk.f32.mxu1 %vm422_vm2, %v3662_v1 }
 0x2b8   :  { %v2821_v2 = vpop.eup %2820  ;;  %v1056_v32 = vadd.f32 %v3615_v54, %v1055_v15  ;;  %2561 = vmatmul.mubr.msk.f32.gmra.mrb[54].mxu1 %vm422_vm2, %v3665_v45  ;;  %v3677_v18 = vadd.f32 %v2819_v10, %v3456_v34 }
 0x2b9   :  { %2830 = vtanh.f32 %v1061_v11  ;;  %v3674_v7 = vadd.f32 %v2821_v2, %v3453_v13 }
 0x2ba   :  { %2832 = vtanh.f32 %v1056_v32  ;;  %v2513_v24 = vpop.f32.mrb[32].mxu0 }
 0x2bb   :  { %v2823_v21 = vpop.eup %2822  ;;  %v1071_v46 = vadd.f32 %v2513_v24, %v3615_v54  ;;  %v1065_v49 = vpop.f32.mrb[33].mxu0  ;;  %2563 = vmatprep.mubr.msk.f32.mxu1 %vm422_vm2, %v3674_v7 }
 0x2bc   :  { %v2825_v39 = vpop.eup %2824  ;;  %v1066_v53 = vadd.f32 %v3615_v54, %v1065_v49  ;;  %2564 = vmatmul.mubr.msk.f32.gmra.mrb[56].mxu1 %vm422_vm2, %v3677_v18  ;;  %v3689_v29 = vadd.f32 %v2823_v21, %v3468_v62 }
 0x2bd   :  { %2834 = vtanh.f32 %v1071_v46  ;;  %v3686_v13 = vadd.f32 %v2825_v39, %v3465_v19 }
 0x2be   :  { %2836 = vtanh.f32 %v1066_v53  ;;  %v2516_v34 = vpop.f32.mrb[34].mxu0 }
 0x2bf   :  { %v2827_v52 = vpop.eup %2826  ;;  %v1081_v55 = vadd.f32 %v2516_v34, %v3615_v54  ;;  %v1075_v30 = vpop.f32.mrb[35].mxu0  ;;  %2566 = vmatprep.mubr.msk.f32.mxu1 %vm422_vm2, %v3686_v13 }
 0x2c0   :  { %v2829_v33 = vpop.eup %2828  ;;  %v1076_v61 = vadd.f32 %v3615_v54, %v1075_v30  ;;  %2567 = vmatmul.mubr.msk.f32.gmra.mrb[58].mxu1 %vm422_vm2, %v3689_v29  ;;  %v3701_v41 = vadd.f32 %v2827_v52, %v3480_v6 }
 0x2c1   :  { %2838 = vtanh.f32 %v1081_v55  ;;  %v3698_v19 = vadd.f32 %v2829_v33, %v3477_v25 }
 0x2c2   :  { %2840 = vtanh.f32 %v1076_v61  ;;  %v2519_v62 = vpop.f32.mrb[36].mxu0 }
 0x2c3   :  { %v2831_v36 = vpop.eup %2830  ;;  %v1091_v56 = vadd.f32 %v2519_v62, %v3615_v54  ;;  %v1085_v57 = vpop.f32.mrb[37].mxu0  ;;  %2569 = vmatprep.mubr.msk.f32.mxu1 %vm422_vm2, %v3698_v19 }
 0x2c4   :  { %v2833_v20 = vpop.eup %2832  ;;  %v1086_v5 = vadd.f32 %v3615_v54, %v1085_v57  ;;  %2570 = vmatmul.mubr.msk.f32.gmra.mrb[60].mxu1 %vm422_vm2, %v3701_v41  ;;  %v3713_v0 = vadd.f32 %v2831_v36, %v3492_v17 }
 0x2c5   :  { %2842 = vtanh.f32 %v1091_v56  ;;  %v3710_v25 = vadd.f32 %v2833_v20, %v3489_v31 }
 0x2c6   :  { %2844 = vtanh.f32 %v1086_v5  ;;  %v2522_v6 = vpop.f32.mrb[38].mxu0 }
 0x2c7   :  { %v2835_v3 = vpop.eup %2834  ;;  %v1101_v4 = vadd.f32 %v2522_v6, %v3615_v54  ;;  %v1095_v60 = vpop.f32.mrb[39].mxu0  ;;  %2572 = vmatprep.mubr.msk.f32.mxu1 %vm422_vm2, %v3710_v25 }
 0x2c8   :  { %v2837_v26 = vpop.eup %2836  ;;  %v1096_v16 = vadd.f32 %v3615_v54, %v1095_v60  ;;  %2573 = vmatmul.mubr.msk.f32.gmra.mrb[62].mxu1 %vm422_vm2, %v3713_v0  ;;  %v3725_v10 = vadd.f32 %v2835_v3, %v3504_v27 }
 0x2c9   :  { %2846 = vtanh.f32 %v1101_v4  ;;  %v3722_v31 = vadd.f32 %v2837_v26, %v3501_v37 }
 0x2ca   :  { %2848 = vtanh.f32 %v1096_v16  ;;  %v2525_v17 = vpop.f32.mrb[40].mxu0 }
 0x2cb   :  { %v2839_v11 = vpop.eup %2838  ;;  %v1111_v15 = vadd.f32 %v2525_v17, %v3615_v54  ;;  %v1105_v2 = vpop.f32.mrb[41].mxu0  ;;  %2575 = vmatprep.mubr.msk.f32.mxu1 %vm422_vm2, %v3722_v31 }
 0x2cc   :  { %v2841_v32 = vpop.eup %2840  ;;  %v1106_v24 = vadd.f32 %v3615_v54, %v1105_v2  ;;  %2576 = vmatmul.mubr.msk.f32.gmra.mrb[64].mxu1 %vm422_vm2, %v3725_v10  ;;  %v3737_v21 = vadd.f32 %v2839_v11, %v3516_v35 }
 0x2cd   :  { %2850 = vtanh.f32 %v1111_v15  ;;  %v3734_v37 = vadd.f32 %v2841_v32, %v3513_v38 }
 0x2ce   :  { %2852 = vtanh.f32 %v1106_v24  ;;  %v2528_v27 = vpop.f32.mrb[42].mxu0 }
 0x2cf   :  { %v2843_v46 = vpop.eup %2842  ;;  %v1121_v49 = vadd.f32 %v2528_v27, %v3615_v54  ;;  %v1115_v39 = vpop.f32.mrb[43].mxu0  ;;  %2578 = vmatprep.mubr.msk.f32.mxu1 %vm422_vm2, %v3734_v37 }
 0x2d0   :  { %v2845_v53 = vpop.eup %2844  ;;  %v1116_v34 = vadd.f32 %v3615_v54, %v1115_v39  ;;  %2579 = vmatmul.mubr.msk.f32.gmra.mrb[66].mxu1 %vm422_vm2, %v3737_v21  ;;  %v3749_v52 = vadd.f32 %v2843_v46, %v3528_v63 }
 0x2d1   :  { %2854 = vtanh.f32 %v1121_v49  ;;  %v3746_v38 = vadd.f32 %v2845_v53, %v3525_v40 }
 0x2d2   :  { %2856 = vtanh.f32 %v1116_v34  ;;  %v2531_v35 = vpop.f32.mrb[44].mxu0 }
 0x2d3   :  { %v2847_v55 = vpop.eup %2846  ;;  %v1131_v30 = vadd.f32 %v2531_v35, %v3615_v54  ;;  %v1125_v33 = vpop.f32.mrb[45].mxu0  ;;  %2581 = vmatprep.mubr.msk.f32.mxu1 %vm422_vm2, %v3746_v38 }
 0x2d4   :  { %v2849_v61 = vpop.eup %2848  ;;  %v1126_v62 = vadd.f32 %v3615_v54, %v1125_v33  ;;  %2582 = vmatmul.mubr.msk.f32.gmra.mrb[68].mxu1 %vm422_vm2, %v3749_v52  ;;  %v3761_v36 = vadd.f32 %v2847_v55, %v3540_v9 }
 0x2d5   :  { %2858 = vtanh.f32 %v1131_v30  ;;  %v3758_v40 = vadd.f32 %v2849_v61, %v3537_v42 }
 0x2d6   :  { %2860 = vtanh.f32 %v1126_v62  ;;  %v2534_v63 = vpop.f32.mrb[46].mxu0 }
 0x2d7   :  { %v2851_v56 = vpop.eup %2850  ;;  %v1141_v57 = vadd.f32 %v2534_v63, %v3615_v54  ;;  %v1135_v20 = vpop.f32.mrb[47].mxu0  ;;  %2584 = vmatprep.mubr.msk.f32.mxu1 %vm422_vm2, %v3758_v40 }
 0x2d8   :  { %v2853_v5 = vpop.eup %2852  ;;  %v1136_v6 = vadd.f32 %v3615_v54, %v1135_v20  ;;  %2585 = vmatmul.mubr.msk.f32.gmra.mrb[70].mxu1 %vm422_vm2, %v3761_v36  ;;  %v3773_v9 = vadd.f32 %v2851_v56, %v3552_v47 }
 0x2d9   :  { %2862 = vtanh.f32 %v1141_v57  ;;  %v3770_v42 = vadd.f32 %v2853_v5, %v3549_v44 }
 0x2da   :  { %2864 = vtanh.f32 %v1136_v6 }
 0x2db   :  { %v2855_v3 = vpop.eup %2854  ;;  %2587 = vmatprep.mubr.msk.f32.mxu1 %vm422_vm2, %v3770_v42 }
 0x2dc   :  { %v2857_v4 = vpop.eup %2856  ;;  %2588 = vmatmul.mubr.msk.f32.gmra.mrb[72].mxu1 %vm422_vm2, %v3773_v9  ;;  %v3783_v60 = vadd.f32 %v2855_v3, %v3562_v22 }
 0x2dd   :  { %v3780_v54 = vadd.f32 %v2857_v4, %v3559_v12 }
 0x2df   :  { %v2859_v44 = vpop.eup %2858  ;;  %2590 = vmatprep.mubr.msk.f32.mxu1 %vm422_vm2, %v3780_v54 }
 0x2e0   :  { %v2861_v47 = vpop.eup %2860  ;;  %2591 = vmatmul.mubr.msk.f32.gmra.mrb[74].mxu1 %vm422_vm2, %v3783_v60  ;;  %v3793_v16 = vadd.f32 %v2859_v44, %v3572_v8  ;;  %v1615_v8 = vld [vmem:[%s3974_s9 + $0x38] sm:$0xff] }
 0x2e1   :  { %v3790_v26 = vadd.f32 %v2861_v47, %v3569_v23  ;;  %v1614_v23 = vld [vmem:[%s3974_s9 + $0x30] sm:$0xff] }
 0x2e2   :  { %v2727_v15 = vpack.c.bf16 %v1615_v8, %v1614_v23 }
 0x2e3   :  { %v2863_v17 = vpop.eup %2862  ;;  %2593 = vmatprep.mubr.msk.f32.mxu1 %vm422_vm2, %v3790_v26 }
 0x2e4   :  { %v2865_v12 = vpop.eup %2864  ;;  %2594 = vmatmul.mubr.msk.f32.gmra.mrb[76].mxu1 %vm422_vm2, %v3793_v16  ;;  %v3803_v11 = vadd.f32 %v2863_v17, %v3582_v28  ;;  %2728 = vmatprep.subr.bf16.mxu0 %v2727_v15 }
 0x2e5   :  { %v3800_v22 = vadd.f32 %v2865_v12, %v3579_v51  ;;  %2730 = vmatpush3.bf16.msra.mxu0 %v2727_v15  ;;  %v3818_v51 = vld [vmem:[%s3973_s8] ss:$0 sm:$0xff] }
 0x2e7   :  { %2596 = vmatprep.mubr.msk.f32.mxu1 %vm422_vm2, %v3800_v22 }
 0x2e8   :  { %2597 = vmatmul.mubr.msk.f32.gmra.mrb[78].mxu1 %vm422_vm2, %v3803_v11 }
 0x37f   :  { %v2553_v28 = vpop.f32.mrb[48].mxu1 }
 0x380   :  { %v1391_v2 = vadd.f32 %v2553_v28, %v3818_v51  ;;  %v1385_v32 = vpop.f32.mrb[49].mxu1 }
 0x381   :  { %v1386_v24 = vadd.f32 %v3818_v51, %v1385_v32 }
 0x382   :  { %2866 = vtanh.f32 %v1391_v2 }
 0x383   :  { %2868 = vtanh.f32 %v1386_v24  ;;  %v2556_v27 = vpop.f32.mrb[50].mxu1 }
 0x384   :  { %v1401_v46 = vadd.f32 %v2556_v27, %v3818_v51  ;;  %v1395_v49 = vpop.f32.mrb[51].mxu1 }
 0x385   :  { %v1396_v39 = vadd.f32 %v3818_v51, %v1395_v49 }
 0x386   :  { %2870 = vtanh.f32 %v1401_v46 }
 0x387   :  { %2872 = vtanh.f32 %v1396_v39  ;;  %v2559_v53 = vpop.f32.mrb[52].mxu1 }
 0x388   :  { %v1411_v34 = vadd.f32 %v2559_v53, %v3818_v51  ;;  %v1405_v35 = vpop.f32.mrb[53].mxu1 }
 0x389   :  { %v1406_v55 = vadd.f32 %v3818_v51, %v1405_v35 }
 0x38a   :  { %2874 = vtanh.f32 %v1411_v34 }
 0x38b   :  { %2876 = vtanh.f32 %v1406_v55  ;;  %v2562_v30 = vpop.f32.mrb[54].mxu1 }
 0x38c   :  { %v2867_v33 = vpop.eup %2866  ;;  %v1421_v61 = vadd.f32 %v2562_v30, %v3818_v51  ;;  %v1415_v62 = vpop.f32.mrb[55].mxu1 }
 0x38d   :  { %v2869_v63 = vpop.eup %2868  ;;  %v1416_v56 = vadd.f32 %v3818_v51, %v1415_v62  ;;  %v1577_v20 = vadd.f32 %v2867_v33, %v3629_v50 }
 0x38e   :  { %2878 = vtanh.f32 %v1421_v61  ;;  %v1576_v57 = vadd.f32 %v2869_v63, %v3626_v48 }
 0x38f   :  { %2880 = vtanh.f32 %v1416_v56  ;;  %v2565_v5 = vpop.f32.mrb[56].mxu1 }
 0x390   :  { %v2871_v6 = vpop.eup %2870  ;;  %v1431_v3 = vadd.f32 %v2565_v5, %v3818_v51  ;;  %v1425_v4 = vpop.f32.mrb[57].mxu1  ;;  %2615 = vmatprep.mubr.msk.f32.mxu0 %vm422_vm2, %v1576_v57 }
 0x391   :  { %v2873_v44 = vpop.eup %2872  ;;  %v1426_v47 = vadd.f32 %v3818_v51, %v1425_v4  ;;  %2616 = vmatmul.mubr.msk.f32.vlgmr.msra.gmra.mrb[48].mxu0 %vm422_vm2, %v1577_v20  ;;  %v1579_v50 = vadd.f32 %v2871_v6, %v3641_v14 }
 0x392   :  { %2882 = vtanh.f32 %v1431_v3  ;;  %v1578_v17 = vadd.f32 %v2873_v44, %v3638_v58 }
 0x393   :  { %2884 = vtanh.f32 %v1426_v47  ;;  %v2568_v48 = vpop.f32.mrb[58].mxu1 }
 0x394   :  { %v2875_v12 = vpop.eup %2874  ;;  %v1441_v23 = vadd.f32 %v2568_v48, %v3818_v51  ;;  %v1435_v8 = vpop.f32.mrb[59].mxu1  ;;  %2618 = vmatprep.mubr.msk.f32.mxu0 %vm422_vm2, %v1578_v17 }
 0x395   :  { %v2877_v15 = vpop.eup %2876  ;;  %v1436_v28 = vadd.f32 %v3818_v51, %v1435_v8  ;;  %2619 = vmatmul.mubr.msk.f32.gmra.mrb[50].mxu0 %vm422_vm2, %v1579_v50  ;;  %v1581_v32 = vadd.f32 %v2875_v12, %v3653_v43 }
 0x396   :  { %2886 = vtanh.f32 %v1441_v23  ;;  %v1580_v2 = vadd.f32 %v2877_v15, %v3650_v59 }
 0x397   :  { %2888 = vtanh.f32 %v1436_v28  ;;  %v2571_v58 = vpop.f32.mrb[60].mxu1 }
 0x398   :  { %v2879_v24 = vpop.eup %2878  ;;  %v1451_v14 = vadd.f32 %v2571_v58, %v3818_v51  ;;  %v1445_v27 = vpop.f32.mrb[61].mxu1  ;;  %2621 = vmatprep.mubr.msk.f32.mxu0 %vm422_vm2, %v1580_v2 }
 0x399   :  { %v2881_v46 = vpop.eup %2880  ;;  %v1446_v49 = vadd.f32 %v3818_v51, %v1445_v27  ;;  %2622 = vmatmul.mubr.msk.f32.gmra.mrb[52].mxu0 %vm422_vm2, %v1581_v32  ;;  %v1583_v53 = vadd.f32 %v2879_v24, %v3665_v45 }
 0x39a   :  { %2890 = vtanh.f32 %v1451_v14  ;;  %v1582_v39 = vadd.f32 %v2881_v46, %v3662_v1 }
 0x39b   :  { %2892 = vtanh.f32 %v1446_v49  ;;  %v2574_v59 = vpop.f32.mrb[62].mxu1 }
 0x39c   :  { %v2883_v34 = vpop.eup %2882  ;;  %v1461_v43 = vadd.f32 %v2574_v59, %v3818_v51  ;;  %v1455_v35 = vpop.f32.mrb[63].mxu1  ;;  %2624 = vmatprep.mubr.msk.f32.mxu0 %vm422_vm2, %v1582_v39 }
 0x39d   :  { %v2885_v55 = vpop.eup %2884  ;;  %v1456_v30 = vadd.f32 %v3818_v51, %v1455_v35  ;;  %2625 = vmatmul.mubr.msk.f32.gmra.mrb[54].mxu0 %vm422_vm2, %v1583_v53  ;;  %v1585_v61 = vadd.f32 %v2883_v34, %v3677_v18 }
 0x39e   :  { %2894 = vtanh.f32 %v1461_v43  ;;  %v1584_v33 = vadd.f32 %v2885_v55, %v3674_v7 }
 0x39f   :  { %2896 = vtanh.f32 %v1456_v30  ;;  %v2577_v1 = vpop.f32.mrb[64].mxu1 }
 0x3a0   :  { %v2887_v62 = vpop.eup %2886  ;;  %v1471_v45 = vadd.f32 %v2577_v1, %v3818_v51  ;;  %v1465_v63 = vpop.f32.mrb[65].mxu1  ;;  %2627 = vmatprep.mubr.msk.f32.mxu0 %vm422_vm2, %v1584_v33 }
 0x3a1   :  { %v2889_v56 = vpop.eup %2888  ;;  %v1466_v57 = vadd.f32 %v3818_v51, %v1465_v63  ;;  %2628 = vmatmul.mubr.msk.f32.gmra.mrb[56].mxu0 %vm422_vm2, %v1585_v61  ;;  %v1587_v5 = vadd.f32 %v2887_v62, %v3689_v29 }
 0x3a2   :  { %2898 = vtanh.f32 %v1471_v45  ;;  %v1586_v20 = vadd.f32 %v2889_v56, %v3686_v13 }
 0x3a3   :  { %2900 = vtanh.f32 %v1466_v57  ;;  %v2580_v7 = vpop.f32.mrb[66].mxu1 }
 0x3a4   :  { %v2891_v6 = vpop.eup %2890  ;;  %v1481_v18 = vadd.f32 %v2580_v7, %v3818_v51  ;;  %v1475_v3 = vpop.f32.mrb[67].mxu1  ;;  %2630 = vmatprep.mubr.msk.f32.mxu0 %vm422_vm2, %v1586_v20 }
 0x3a5   :  { %v2893_v4 = vpop.eup %2892  ;;  %v1476_v44 = vadd.f32 %v3818_v51, %v1475_v3  ;;  %2631 = vmatmul.mubr.msk.f32.gmra.mrb[58].mxu0 %vm422_vm2, %v1587_v5  ;;  %v1589_v17 = vadd.f32 %v2891_v6, %v3701_v41 }
 0x3a6   :  { %2902 = vtanh.f32 %v1481_v18  ;;  %v1588_v47 = vadd.f32 %v2893_v4, %v3698_v19 }
 0x3a7   :  { %2904 = vtanh.f32 %v1476_v44  ;;  %v2583_v13 = vpop.f32.mrb[68].mxu1 }
 0x3a8   :  { %v2895_v48 = vpop.eup %2894  ;;  %v1491_v29 = vadd.f32 %v2583_v13, %v3818_v51  ;;  %v1485_v50 = vpop.f32.mrb[69].mxu1  ;;  %2633 = vmatprep.mubr.msk.f32.mxu0 %vm422_vm2, %v1588_v47 }
 0x3a9   :  { %v2897_v12 = vpop.eup %2896  ;;  %v1486_v23 = vadd.f32 %v3818_v51, %v1485_v50  ;;  %2634 = vmatmul.mubr.msk.f32.gmra.mrb[60].mxu0 %vm422_vm2, %v1589_v17  ;;  %v1591_v15 = vadd.f32 %v2895_v48, %v3713_v0 }
 0x3aa   :  { %2906 = vtanh.f32 %v1491_v29  ;;  %v1590_v8 = vadd.f32 %v2897_v12, %v3710_v25 }
 0x3ab   :  { %2908 = vtanh.f32 %v1486_v23  ;;  %v2586_v19 = vpop.f32.mrb[70].mxu1 }
 0x3ac   :  { %v2899_v28 = vpop.eup %2898  ;;  %v1501_v41 = vadd.f32 %v2586_v19, %v3818_v51  ;;  %v1495_v2 = vpop.f32.mrb[71].mxu1  ;;  %2636 = vmatprep.mubr.msk.f32.mxu0 %vm422_vm2, %v1590_v8 }
 0x3ad   :  { %v2901_v58 = vpop.eup %2900  ;;  %v1496_v32 = vadd.f32 %v3818_v51, %v1495_v2  ;;  %2637 = vmatmul.mubr.msk.f32.gmra.mrb[62].mxu0 %vm422_vm2, %v1591_v15  ;;  %v1593_v14 = vadd.f32 %v2899_v28, %v3725_v10 }
 0x3ae   :  { %2910 = vtanh.f32 %v1501_v41  ;;  %v1592_v24 = vadd.f32 %v2901_v58, %v3722_v31 }
 0x3af   :  { %2912 = vtanh.f32 %v1496_v32  ;;  %v2589_v25 = vpop.f32.mrb[72].mxu1 }
 0x3b0   :  { %v2903_v27 = vpop.eup %2902  ;;  %v1511_v0 = vadd.f32 %v2589_v25, %v3818_v51  ;;  %v1505_v46 = vpop.f32.mrb[73].mxu1  ;;  %2639 = vmatprep.mubr.msk.f32.mxu0 %vm422_vm2, %v1592_v24 }
 0x3b1   :  { %v2905_v49 = vpop.eup %2904  ;;  %v1506_v39 = vadd.f32 %v3818_v51, %v1505_v46  ;;  %2640 = vmatmul.mubr.msk.f32.gmra.mrb[64].mxu0 %vm422_vm2, %v1593_v14  ;;  %v1595_v53 = vadd.f32 %v2903_v27, %v3737_v21 }
 0x3b2   :  { %2914 = vtanh.f32 %v1511_v0  ;;  %v1594_v59 = vadd.f32 %v2905_v49, %v3734_v37 }
 0x3b3   :  { %2916 = vtanh.f32 %v1506_v39  ;;  %v2592_v31 = vpop.f32.mrb[74].mxu1 }
 0x3b4   :  { %v2907_v34 = vpop.eup %2906  ;;  %v1521_v10 = vadd.f32 %v2592_v31, %v3818_v51  ;;  %v1515_v43 = vpop.f32.mrb[75].mxu1  ;;  %2642 = vmatprep.mubr.msk.f32.mxu0 %vm422_vm2, %v1594_v59 }
 0x3b5   :  { %v2909_v35 = vpop.eup %2908  ;;  %v1516_v55 = vadd.f32 %v3818_v51, %v1515_v43  ;;  %2643 = vmatmul.mubr.msk.f32.gmra.mrb[66].mxu0 %vm422_vm2, %v1595_v53  ;;  %v1597_v33 = vadd.f32 %v2907_v34, %v3749_v52 }
 0x3b6   :  { %2918 = vtanh.f32 %v1521_v10  ;;  %v1596_v30 = vadd.f32 %v2909_v35, %v3746_v38 }
 0x3b7   :  { %2920 = vtanh.f32 %v1516_v55  ;;  %v2595_v37 = vpop.f32.mrb[76].mxu1 }
 0x3b8   :  { %v2911_v1 = vpop.eup %2910  ;;  %v1531_v21 = vadd.f32 %v2595_v37, %v3818_v51  ;;  %v1525_v61 = vpop.f32.mrb[77].mxu1  ;;  %2645 = vmatprep.mubr.msk.f32.mxu0 %vm422_vm2, %v1596_v30 }
 0x3b9   :  { %v2913_v62 = vpop.eup %2912  ;;  %v1526_v45 = vadd.f32 %v3818_v51, %v1525_v61  ;;  %2646 = vmatmul.mubr.msk.f32.gmra.mrb[68].mxu0 %vm422_vm2, %v1597_v33  ;;  %v1599_v56 = vadd.f32 %v2911_v1, %v3761_v36 }
 0x3ba   :  { %2922 = vtanh.f32 %v1531_v21  ;;  %v1598_v63 = vadd.f32 %v2913_v62, %v3758_v40 }
 0x3bb   :  { %2924 = vtanh.f32 %v1526_v45  ;;  %v2598_v38 = vpop.f32.mrb[78].mxu1 }
 0x3bc   :  { %v2915_v57 = vpop.eup %2914  ;;  %v1541_v52 = vadd.f32 %v2598_v38, %v3818_v51  ;;  %v1535_v20 = vpop.f32.mrb[79].mxu1  ;;  %2648 = vmatprep.mubr.msk.f32.mxu0 %vm422_vm2, %v1598_v63 }
 0x3bd   :  { %v2917_v7 = vpop.eup %2916  ;;  %v1536_v5 = vadd.f32 %v3818_v51, %v1535_v20  ;;  %2649 = vmatmul.mubr.msk.f32.gmra.mrb[70].mxu0 %vm422_vm2, %v1599_v56  ;;  %v1601_v40 = vadd.f32 %v2915_v57, %v3773_v9 }
 0x3be   :  { %2926 = vtanh.f32 %v1541_v52  ;;  %v1600_v6 = vadd.f32 %v2917_v7, %v3770_v42 }
 0x3bf   :  { %2928 = vtanh.f32 %v1536_v5 }
 0x3c0   :  { %v2919_v18 = vpop.eup %2918  ;;  %2651 = vmatprep.mubr.msk.f32.mxu0 %vm422_vm2, %v1600_v6 }
 0x3c1   :  { %v2921_v36 = vpop.eup %2920  ;;  %2652 = vmatmul.mubr.msk.f32.gmra.mrb[72].mxu0 %vm422_vm2, %v1601_v40  ;;  %v1603_v4 = vadd.f32 %v2919_v18, %v3783_v60 }
 0x3c2   :  { %v1602_v3 = vadd.f32 %v2921_v36, %v3780_v54 }
 0x3c4   :  { %v2923_v44 = vpop.eup %2922  ;;  %2654 = vmatprep.mubr.msk.f32.mxu0 %vm422_vm2, %v1602_v3 }
 0x3c5   :  { %v2925_v51 = vpop.eup %2924  ;;  %2655 = vmatmul.mubr.msk.f32.gmra.mrb[74].mxu0 %vm422_vm2, %v1603_v4  ;;  %v1605_v9 = vadd.f32 %v2923_v44, %v3793_v16 }
 0x3c6   :  { %v1604_v42 = vadd.f32 %v2925_v51, %v3790_v26  ;;  %v3919_v26 = vld [vmem:[%s3975_s10] ss:$0 sm:$0xff]  ;;  %s2954_s10 = smov [#allocation2]  }
 0x3c7   :  { %s1981_s26 = sshll.u32 %s2954_s10, 4  ;;  %s1982_s26 = int_to_ptr.vmem [resolvable:$true] %s1981_s26 }
 0x3c8   :  { %v2927_v47 = vpop.eup %2926  ;;  %2657 = vmatprep.mubr.msk.f32.mxu0 %vm422_vm2, %v1604_v42  ;;  %s2930_s27 = scalar_lea.vmem %s1982_s26, 4096  ;;  %p2935_p1 = scmp.lt.s32.totalorder %s1982_s26, %s1982_s26 }
 0x3c9   :  { %v2929_v13 = vpop.eup %2928  ;;  %2658 = vmatmul.mubr.msk.f32.gmra.mrb[76].mxu0 %vm422_vm2, %v1605_v9  ;;  %v1607_v60 = vadd.f32 %v2927_v47, %v3803_v11  ;;  %p2931_p0 = scmp.ne.s32.totalorder %s1982_s26, %s2930_s27  ;;  %p2936_p2 = scmp.lt.s32.totalorder %s2930_s27, %s2930_s27 }
 0x3ca   :  { %v1606_v54 = vadd.f32 %v2929_v13, %v3800_v22 }
 0x3cb   :  { %p2937_p3 = por %p2936_p2, %p2935_p1 }
 0x3cc   :  { %2660 = vmatprep.mubr.msk.f32.mxu0 %vm422_vm2, %v1606_v54 }
 0x3cd   :  { %2661 = vmatmul.mubr.msk.f32.gmra.mrb[78].mxu0 %vm422_vm2, %v1607_v60  ;;  %p2938_p4 = pnand %p2937_p3, %p2931_p0 }
 0x464   :  { %v2617_v16 = vpop.f32.mrb[48].mxu0 }
 0x465   :  { %v1791_v17 = vadd.f32 %v2617_v16, %v3919_v26  ;;  %v1785_v48 = vpop.f32.mrb[49].mxu0 }
 0x466   :  { %v1786_v29 = vadd.f32 %v3919_v26, %v1785_v48 }
 0x467   :  { %1945 = vst [vmem:[#allocation2 + $0x8] sm:$0xff] %v1791_v17 }
 0x468   :  { %1944 = vst [vmem:[#allocation2] sm:$0xff] %v1786_v29  ;;  %v2620_v22 = vpop.f32.mrb[50].mxu0 }
 0x469   :  { %v1801_v11 = vadd.f32 %v2620_v22, %v3919_v26  ;;  %v1795_v50 = vpop.f32.mrb[51].mxu0 }
 0x46a   :  { %v1796_v12 = vadd.f32 %v3919_v26, %v1795_v50 }
 0x46b   :  { %1947 = vst [vmem:[#allocation2 + $0x18] sm:$0xff] %v1801_v11 }
 0x46c   :  { %1946 = vst [vmem:[#allocation2 + $0x10] sm:$0xff] %v1796_v12  ;;  %v2623_v23 = vpop.f32.mrb[52].mxu0 }
 0x46d   :  { %v1811_v8 = vadd.f32 %v2623_v23, %v3919_v26  ;;  %v1805_v19 = vpop.f32.mrb[53].mxu0 }
 0x46e   :  { %v1806_v15 = vadd.f32 %v3919_v26, %v1805_v19 }
 0x46f   :  { %1949 = vst [vmem:[#allocation2 + $0x28] sm:$0xff] %v1811_v8 }
 0x470   :  { %1948 = vst [vmem:[#allocation2 + $0x20] sm:$0xff] %v1806_v15  ;;  %v2626_v28 = vpop.f32.mrb[54].mxu0 }
 0x471   :  { %v1821_v41 = vadd.f32 %v2626_v28, %v3919_v26  ;;  %v1815_v2 = vpop.f32.mrb[55].mxu0 }
 0x472   :  { %v1816_v58 = vadd.f32 %v3919_v26, %v1815_v2 }
 0x473   :  { %1951 = vst [vmem:[#allocation2 + $0x38] sm:$0xff] %v1821_v41 }
 0x474   :  { %1950 = vst [vmem:[#allocation2 + $0x30] sm:$0xff] %v1816_v58  ;;  %v2629_v32 = vpop.f32.mrb[56].mxu0 }
 0x475   :  { %v1831_v24 = vadd.f32 %v2629_v32, %v3919_v26  ;;  %v1825_v25 = vpop.f32.mrb[57].mxu0 }
 0x476   :  { %v1826_v14 = vadd.f32 %v3919_v26, %v1825_v25 }
 0x477   :  { %1953 = vst [vmem:[#allocation2 + $0x48] sm:$0xff] %v1831_v24 }
 0x478   :  { %1952 = vst [vmem:[#allocation2 + $0x40] sm:$0xff] %v1826_v14  ;;  %v2632_v27 = vpop.f32.mrb[58].mxu0 }
 0x479   :  { %v1841_v0 = vadd.f32 %v2632_v27, %v3919_v26  ;;  %v1835_v46 = vpop.f32.mrb[59].mxu0 }
 0x47a   :  { %v1836_v49 = vadd.f32 %v3919_v26, %v1835_v46 }
 0x47b   :  { %1955 = vst [vmem:[#allocation2 + $0x58] sm:$0xff] %v1841_v0 }
 0x47c   :  { %1954 = vst [vmem:[#allocation2 + $0x50] sm:$0xff] %v1836_v49  ;;  %v2635_v39 = vpop.f32.mrb[60].mxu0 }
 0x47d   :  { %v1851_v59 = vadd.f32 %v2635_v39, %v3919_v26  ;;  %v1845_v31 = vpop.f32.mrb[61].mxu0 }
 0x47e   :  { %v1846_v53 = vadd.f32 %v3919_v26, %v1845_v31 }
 0x47f   :  { %1957 = vst [vmem:[#allocation2 + $0x68] sm:$0xff] %v1851_v59 }
 0x480   :  { %1956 = vst [vmem:[#allocation2 + $0x60] sm:$0xff] %v1846_v53  ;;  %v2638_v34 = vpop.f32.mrb[62].mxu0 }
 0x481   :  { %v1861_v10 = vadd.f32 %v2638_v34, %v3919_v26  ;;  %v1855_v43 = vpop.f32.mrb[63].mxu0 }
 0x482   :  { %v1856_v35 = vadd.f32 %v3919_v26, %v1855_v43 }
 0x483   :  { %1959 = vst [vmem:[#allocation2 + $0x78] sm:$0xff] %v1861_v10 }
 0x484   :  { %1958 = vst [vmem:[#allocation2 + $0x70] sm:$0xff] %v1856_v35  ;;  %v2641_v55 = vpop.f32.mrb[64].mxu0 }
 0x485   :  { %v1871_v30 = vadd.f32 %v2641_v55, %v3919_v26  ;;  %v1865_v37 = vpop.f32.mrb[65].mxu0 }
 0x486   :  { %v1866_v33 = vadd.f32 %v3919_v26, %v1865_v37 }
 0x487   :  { %1961 = vst [vmem:[#allocation2 + $0x88] sm:$0xff] %v1871_v30 }
 0x488   :  { %1960 = vst [vmem:[#allocation2 + $0x80] sm:$0xff] %v1866_v33  ;;  %v2644_v1 = vpop.f32.mrb[66].mxu0 }
 0x489   :  { %v1881_v21 = vadd.f32 %v2644_v1, %v3919_v26  ;;  %v1875_v61 = vpop.f32.mrb[67].mxu0 }
 0x48a   :  { %v1876_v62 = vadd.f32 %v3919_v26, %v1875_v61 }
 0x48b   :  { %1963 = vst [vmem:[#allocation2 + $0x98] sm:$0xff] %v1881_v21 }
 0x48c   :  { %1962 = vst [vmem:[#allocation2 + $0x90] sm:$0xff] %v1876_v62  ;;  %v2647_v45 = vpop.f32.mrb[68].mxu0 }
 0x48d   :  { %v1891_v63 = vadd.f32 %v2647_v45, %v3919_v26  ;;  %v1885_v38 = vpop.f32.mrb[69].mxu0 }
 0x48e   :  { %v1886_v56 = vadd.f32 %v3919_v26, %v1885_v38 }
 0x48f   :  { %1965 = vst [vmem:[#allocation2 + $0xa8] sm:$0xff] %v1891_v63 }
 0x490   :  { %1964 = vst [vmem:[#allocation2 + $0xa0] sm:$0xff] %v1886_v56  ;;  %v2650_v57 = vpop.f32.mrb[70].mxu0 }
 0x491   :  { %v1901_v52 = vadd.f32 %v2650_v57, %v3919_v26  ;;  %v1895_v20 = vpop.f32.mrb[71].mxu0 }
 0x492   :  { %v1896_v7 = vadd.f32 %v3919_v26, %v1895_v20 }
 0x493   :  { %1967 = vst [vmem:[#allocation2 + $0xb8] sm:$0xff] %v1901_v52 }
 0x494   :  { %1966 = vst [vmem:[#allocation2 + $0xb0] sm:$0xff] %v1896_v7  ;;  %v2653_v5 = vpop.f32.mrb[72].mxu0 }
 0x495   :  { %v1911_v6 = vadd.f32 %v2653_v5, %v3919_v26  ;;  %v1905_v40 = vpop.f32.mrb[73].mxu0 }
 0x496   :  { %v1906_v18 = vadd.f32 %v3919_v26, %v1905_v40 }
 0x497   :  { %1969 = vst [vmem:[#allocation2 + $0xc8] sm:$0xff] %v1911_v6 }
 0x498   :  { %1968 = vst [vmem:[#allocation2 + $0xc0] sm:$0xff] %v1906_v18  ;;  %v2656_v36 = vpop.f32.mrb[74].mxu0 }
 0x499   :  { %v1921_v3 = vadd.f32 %v2656_v36, %v3919_v26  ;;  %v1915_v4 = vpop.f32.mrb[75].mxu0 }
 0x49a   :  { %v1916_v44 = vadd.f32 %v3919_v26, %v1915_v4 }
 0x49b   :  { %1971 = vst [vmem:[#allocation2 + $0xd8] sm:$0xff] %v1921_v3 }
 0x49c   :  { %1970 = vst [vmem:[#allocation2 + $0xd0] sm:$0xff] %v1916_v44  ;;  %v2659_v51 = vpop.f32.mrb[76].mxu0 }
 0x49d   :  { %v1931_v42 = vadd.f32 %v2659_v51, %v3919_v26  ;;  %v1925_v9 = vpop.f32.mrb[77].mxu0 }
 0x49e   :  { %v1926_v47 = vadd.f32 %v3919_v26, %v1925_v9 }
 0x49f   :  { %1973 = vst [vmem:[#allocation2 + $0xe8] sm:$0xff] %v1931_v42 }
 0x4a0   :  { %1972 = vst [vmem:[#allocation2 + $0xe0] sm:$0xff] %v1926_v47  ;;  %v2662_v13 = vpop.f32.mrb[78].mxu0 }
 0x4a1   :  { %v1941_v54 = vadd.f32 %v2662_v13, %v3919_v26  ;;  %v1935_v60 = vpop.f32.mrb[79].mxu0 }
 0x4a2   :  { %v1936_v16 = vadd.f32 %v3919_v26, %v1935_v60 }
 0x4a3   :  { %1975 = vst [vmem:[#allocation2 + $0xf8] sm:$0xff] %v1941_v54 }
 0x4a4   :  { %1974 = vst [vmem:[#allocation2 + $0xf0] sm:$0xff] %v1936_v16 }
 0x4a5   :  { %2941 = shalt.err (!%p2938_p4)
}
 0x4a6   :  { %s2942_s0 = scalar_lea.hbm %s3976_s11, 4096 }
 0x4a7   :  { %p2943_p5 = scmp.ne.s32.totalorder %s3976_s11, %s2942_s0  ;;  %p2946_p6 = scmp.lt.u32.totalorder %s2942_s0, %s3976_s11 }
 0x4a9   :  { %p2948_p7 = pnand %p2946_p6, %p2943_p5 }
 0x4ab   :  { %2951 = shalt.err (!%p2948_p7)
}
 0x4ac   :  { %s2955_s12 = smov 128   ;;  %s2956_s13 = smov 8  }
 0x4ad   :  { %1987 = dma.vmem_to_hbm [thread:$0]  %s1982_s26, 4096, %s3976_s11, [#allocation3], %s2955_s12, %s2955_s12, %s2956_s13  }
 0x4ae   :  { %2952 = dma.done.wait [#allocation3], 4096  }
 0x4af   :  { %2953 = vsyncadd [#allocation3], 4294963200 }
 0x4b0   :  { %1991 = vsyncpa [#allocation3], 1 }

</bundles_post_ra>
